<compile_context>
chip_gen: v6e
topology: v6e:2x2x1
jax: 0.10.0
libtpu: 0.0.40
codegen_flags: <defaults>
</compile_context>

<pallas_src>
import jax
import jax.numpy as jnp
from jax.experimental import pallas as pl
from jax.experimental.pallas import tpu as pltpu


def _cfm_kernel(s_ref, q_ref, m_ref, ws_ref, wq_ref, bf_ref, wm_ref, bm_ref, o_ref):
    # 1x1 fusion conv as MXU matmuls: out(C, tile_hw) = W_s @ s + W_q @ q.
    # Activations arrive f32 straight from HBM; cast to bf16 here (VPU) so the
    # wrapper never does a separate cast pass over HBM.
    s = s_ref[0].astype(jnp.bfloat16)
    q = q_ref[0].astype(jnp.bfloat16)
    fused = jnp.dot(ws_ref[...], s, preferred_element_type=jnp.float32)
    fused = fused + jnp.dot(wq_ref[...], q, preferred_element_type=jnp.float32)
    fused = fused + bf_ref[...]                      # (C, 1) bias, lane-broadcast
    # 1x1 mask conv on the (already resized) 1-channel mask: rank-1 affine (VPU).
    mask_proj = wm_ref[...] * m_ref[0] + bm_ref[...]  # (C,1)*(1,thw)+(C,1)
    o_ref[0] = (fused * mask_proj).astype(o_ref.dtype)


_VMEM_BUDGET = 36 * 1024 * 1024   # target resident pipeline-buffer bytes (gen-safe)


def _choose_tile_hw(C, HW, N, out_bytes):
    """Pick the lane (pixel) tile: big, VMEM-budget-aware, no pad-to-tile overshoot."""
    # Per-lane-column pipeline bytes: s + q (f32, double-buffered) + out (double-buffered).
    per_lane = 2 * (2 * C * 4) + 2 * C * out_bytes
    # Weights/biases resident once (pl.Buffered(1)), bf16 weight halves.
    weights_resident = 2 * C * C * 2 + 3 * C * 4
    if C <= 512:
        target = 2048
    elif C <= 1024:
        target = 1024
    else:
        target = 512
    budget_cap = max(128, ((_VMEM_BUDGET - weights_resident) // per_lane) // 128 * 128)
    cap = min(target, budget_cap)
    if HW <= cap:
        tile_hw, n_hw = HW, 1          # single full-extent block: zero wasted lanes
    else:
        tile_hw = cap                  # multiple of 128; final block may be partial
        n_hw = pl.cdiv(HW, tile_hw)
    # v7x has 2 TensorCores: when batch can't provide parallelism, split hw in two.
    if N == 1 and n_hw == 1 and HW >= 256:
        tile_hw = (((HW + 1) // 2) + 127) // 128 * 128
        n_hw = pl.cdiv(HW, tile_hw)
    return tile_hw, n_hw


def cfm_level(s, q, mask_resized, w_s, w_q, b_fuse, w_mask, b_mask,
              *, out_dtype=jnp.float32):
    """One pyramid level.  s, q: (N, C, H, W) f32; mask_resized: (N, 1, H, W) f32."""
    N, C, H, W = s.shape
    HW = H * W
    out_bytes = jnp.dtype(out_dtype).itemsize
    tile_hw, n_hw = _choose_tile_hw(C, HW, N, out_bytes)

    # NCHW -> (N, C, HW) is a pure reshape (no HBM pass); activations stay f32.
    s_r = s.reshape(N, C, HW)
    q_r = q.reshape(N, C, HW)
    m_r = mask_resized.reshape(N, 1, HW).astype(jnp.float32)

    # Weight prep is tiny (C*C elements vs N*C*HW activations); bf16 halves the
    # resident weight VMEM (16 MiB total at C=2048) and feeds the MXU directly.
    w_s_b = w_s.astype(jnp.bfloat16)
    w_q_b = w_q.astype(jnp.bfloat16)
    b_f = b_fuse.reshape(C, 1).astype(jnp.float32)
    w_m = w_mask.reshape(C, 1).astype(jnp.float32)
    b_m = b_mask.reshape(C, 1).astype(jnp.float32)

    # Constant operands (block index never changes over the grid): single pipeline
    # buffer — double-buffering a constant is pure VMEM waste.
    def const_spec(shape):
        return pl.BlockSpec(shape, lambda n, h: (0, 0), pipeline_mode=pl.Buffered(1))

    grid = (N, n_hw)   # both axes fully parallel (no reduction axis)

    out = pl.pallas_call(
        _cfm_kernel,
        out_shape=jax.ShapeDtypeStruct((N, C, HW), out_dtype),
        grid_spec=pltpu.PrefetchScalarGridSpec(
            num_scalar_prefetch=0,
            grid=grid,
            in_specs=[
                pl.BlockSpec((1, C, tile_hw), lambda n, h: (n, 0, h)),   # support (f32)
                pl.BlockSpec((1, C, tile_hw), lambda n, h: (n, 0, h)),   # query   (f32)
                pl.BlockSpec((1, 1, tile_hw), lambda n, h: (n, 0, h)),   # resized mask
                const_spec((C, C)),                                      # W_fuse, support half
                const_spec((C, C)),                                      # W_fuse, query half
                const_spec((C, 1)),                                      # fusion bias
                const_spec((C, 1)),                                      # mask conv weight
                const_spec((C, 1)),                                      # mask conv bias
            ],
            out_specs=pl.BlockSpec((1, C, tile_hw), lambda n, h: (n, 0, h)),
        ),
        compiler_params=pltpu.CompilerParams(
            dimension_semantics=("parallel", "parallel"),
            vmem_limit_bytes=48 * 1024 * 1024,
        ),
    )(s_r, q_r, m_r, w_s_b, w_q_b, b_f, w_m, b_m)

    return out.reshape(N, C, H, W)


def _bilinear_resize_nchw(x, out_h, out_w):
    """PyTorch F.interpolate(mode='bilinear', align_corners=False) on NCHW."""
    N, C, H, W = x.shape

    def src_idx(out_size, in_size):
        scale = in_size / out_size
        dst = jnp.arange(out_size, dtype=jnp.float32)
        src = jnp.maximum((dst + 0.5) * scale - 0.5, 0.0)
        i0 = jnp.minimum(jnp.floor(src).astype(jnp.int32), in_size - 1)
        i1 = jnp.minimum(i0 + 1, in_size - 1)
        l1 = src - i0.astype(jnp.float32)
        return i0, i1, 1.0 - l1, l1

    y0, y1, ly0, ly1 = src_idx(out_h, H)
    x0, x1, lx0, lx1 = src_idx(out_w, W)
    rows = (x[:, :, y0, :] * ly0[None, None, :, None]
            + x[:, :, y1, :] * ly1[None, None, :, None])
    out = (rows[:, :, :, x0] * lx0[None, None, None, :]
           + rows[:, :, :, x1] * lx1[None, None, None, :])
    return out


def init_params(feat_channels, key):
    """Deterministic synthetic parameters matching the nn.Module shapes."""
    params = []
    for c in feat_channels:
        key, k1, k2, k3, k4, k5 = jax.random.split(key, 6)
        # Conv2d(2c, c, 1) weight (c, 2c, 1, 1), stored split: support half / query half.
        w_s = jax.random.normal(k1, (c, c), jnp.float32) * 0.02
        w_q = jax.random.normal(k2, (c, c), jnp.float32) * 0.02
        b_fuse = jax.random.normal(k3, (c,), jnp.float32) * 0.02
        # Conv2d(1, c, 1) weight (c, 1, 1, 1) stored as (c,), plus bias (c,).
        w_mask = jax.random.normal(k4, (c,), jnp.float32) * 0.02
        b_mask = jax.random.normal(k5, (c,), jnp.float32) * 0.02
        params.append((w_s, w_q, b_fuse, w_mask, b_mask))
    return params


def cross_feature_module(support_feats, query_feats, support_mask, params,
                         *, out_dtype=jnp.float32):
    """support_feats/query_feats: lists of (N, C_i, H_i, W_i); mask: (N, 1, Hm, Wm)."""
    # The conv<->resize commutation below is exact ONLY because the mask head has a
    # single input channel (per-output-channel affine) and bilinear weights sum to 1.
    assert support_mask.shape[1] == 1, "mask_transform assumes a 1-channel mask"
    outs = []
    for (s, q), p in zip(zip(support_feats, query_feats), params):
        _, _, H, W = s.shape
        # TODO(synk): bilinear resize is a data-dependent gather; kept as plain-JAX
        # glue on the 1-channel mask (tiny) rather than an in-kernel gather.
        m = _bilinear_resize_nchw(support_mask, H, W)
        outs.append(cfm_level(s, q, m, *p, out_dtype=out_dtype))
    return outs


def _cfm_reference(s, q, m, w_s, w_q, b_fuse, w_mask, b_mask):
    """Pure-JAX f32 reference (1x1 convs as einsums) for a single level."""
    fused = (jnp.einsum('oc,nchw->nohw', w_s, s)
             + jnp.einsum('oc,nchw->nohw', w_q, q)
             + b_fuse[None, :, None, None])
    mask_proj = w_mask[None, :, None, None] * m + b_mask[None, :, None, None]
    return fused * mask_proj


if __name__ == "__main__":
    key = jax.random.PRNGKey(0)
    # Small stand-ins for [256, 512, 1024, 2048]; spatial sizes chosen to cover
    # HW multiple-of-128 (256), HW > 128 but not a multiple (144), and HW < 128 (64).
    feat_channels = [32, 64, 128]
    spatial = [16, 12, 8]
    N = 2

    kf, km, kp = jax.random.split(key, 3)
    support_feats, query_feats = [], []
    for c, sz in zip(feat_channels, spatial):
        kf, k1, k2 = jax.random.split(kf, 3)
        support_feats.append(jax.random.normal(k1, (N, c, sz, sz), jnp.float32))
        query_feats.append(jax.random.normal(k2, (N, c, sz, sz), jnp.float32))
    support_mask = jax.random.uniform(km, (N, 1, 32, 32), jnp.float32)

    params = init_params(feat_channels, kp)

    # Single jit over the per-level loop + resize glue (lets XLA overlap the tiny
    # glue with the previous level's pallas_call and avoids eager dispatch).
    cfm_jit = jax.jit(cross_feature_module)
    outs = jax.block_until_ready(
        cfm_jit(support_feats, query_feats, support_mask, params))

    # Shape + loose numeric check against a pure-JAX f32 reference (kernel matmuls
    # run in bf16 with f32 accumulation).
    for i, (c, sz) in enumerate(zip(feat_channels, spatial)):
        assert outs[i].shape == (N, c, sz, sz)
        m = _bilinear_resize_nchw(support_mask, sz, sz)
        ref = _cfm_reference(support_feats[i], query_feats[i], m, *params[i])
        assert jnp.allclose(outs[i], ref, rtol=5e-2, atol=2e-2), (
            f"level {i} max abs err {jnp.max(jnp.abs(outs[i] - ref))}")
    print("KERNEL_OK")
</pallas_src>

<mosaic_0001>
module attributes {stable_mosaic.version = 11 : i64} {
  func.func @_cfm_kernel(%arg0: i32, %arg1: i32, %arg2: memref<1x64x144xf32, #tpu.memory_space<vmem>>, %arg3: memref<1x64x144xf32, #tpu.memory_space<vmem>>, %arg4: memref<1x1x144xf32, #tpu.memory_space<vmem>>, %arg5: memref<64x64xbf16, #tpu.memory_space<vmem>>, %arg6: memref<64x64xbf16, #tpu.memory_space<vmem>>, %arg7: memref<64x1xf32, #tpu.memory_space<vmem>>, %arg8: memref<64x1xf32, #tpu.memory_space<vmem>>, %arg9: memref<64x1xf32, #tpu.memory_space<vmem>>, %arg10: memref<1x64x144xf32, #tpu.memory_space<vmem>>) attributes {dimension_semantics = [#tpu.dimension_semantics<parallel>, #tpu.dimension_semantics<parallel>], iteration_bounds = array<i64: 2, 1>, scalar_prefetch = 0 : i64, scratch_operands = 0 : i64, tpu.core_type = #tpu.core_type<tc>, window_params = [{transform_indices = @transform_0, window_bounds = array<i64: 1, 64, 144>}, {transform_indices = @transform_1, window_bounds = array<i64: 1, 64, 144>}, {transform_indices = @transform_2, window_bounds = array<i64: 1, 1, 144>}, {pipeline_mode = #tpu.pipeline_mode<synchronous>, transform_indices = @transform_3, window_bounds = array<i64: 64, 64>}, {pipeline_mode = #tpu.pipeline_mode<synchronous>, transform_indices = @transform_4, window_bounds = array<i64: 64, 64>}, {pipeline_mode = #tpu.pipeline_mode<synchronous>, transform_indices = @transform_5, window_bounds = array<i64: 64, 1>}, {pipeline_mode = #tpu.pipeline_mode<synchronous>, transform_indices = @transform_6, window_bounds = array<i64: 64, 1>}, {pipeline_mode = #tpu.pipeline_mode<synchronous>, transform_indices = @transform_7, window_bounds = array<i64: 64, 1>}, {transform_indices = @transform_8, window_bounds = array<i64: 1, 64, 144>}]} {
    %c0 = arith.constant 0 : index
    %c0_0 = arith.constant 0 : index
    %c0_1 = arith.constant 0 : index
    %0 = vector.load %arg2[%c0, %c0_0, %c0_1] : memref<1x64x144xf32, #tpu.memory_space<vmem>>, vector<1x64x144xf32>
    %1 = vector.shape_cast %0 : vector<1x64x144xf32> to vector<64x144xf32>
    %2 = arith.truncf %1 : vector<64x144xf32> to vector<64x144xbf16>
    %c0_2 = arith.constant 0 : index
    %c0_3 = arith.constant 0 : index
    %c0_4 = arith.constant 0 : index
    %3 = vector.load %arg3[%c0_2, %c0_3, %c0_4] : memref<1x64x144xf32, #tpu.memory_space<vmem>>, vector<1x64x144xf32>
    %4 = vector.shape_cast %3 : vector<1x64x144xf32> to vector<64x144xf32>
    %5 = arith.truncf %4 : vector<64x144xf32> to vector<64x144xbf16>
    %c0_5 = arith.constant 0 : index
    %c0_6 = arith.constant 0 : index
    %6 = vector.load %arg5[%c0_5, %c0_6] : memref<64x64xbf16, #tpu.memory_space<vmem>>, vector<64x64xbf16>
    %cst = arith.constant dense<0.000000e+00> : vector<64x144xf32>
    %7 = tpu.matmul %6, %2, %cst {dimension_numbers = #tpu.dot_dimension_numbers<[1], [0], [0], [1], [0, 0, 1, 1], [], []>} : vector<64x64xbf16>, vector<64x144xbf16>, vector<64x144xf32> -> vector<64x144xf32>
    %c0_7 = arith.constant 0 : index
    %c0_8 = arith.constant 0 : index
    %8 = vector.load %arg6[%c0_7, %c0_8] : memref<64x64xbf16, #tpu.memory_space<vmem>>, vector<64x64xbf16>
    %cst_9 = arith.constant dense<0.000000e+00> : vector<64x144xf32>
    %9 = tpu.matmul %8, %5, %cst_9 {dimension_numbers = #tpu.dot_dimension_numbers<[1], [0], [0], [1], [0, 0, 1, 1], [], []>} : vector<64x64xbf16>, vector<64x144xbf16>, vector<64x144xf32> -> vector<64x144xf32>
    %10 = arith.addf %7, %9 : vector<64x144xf32>
    %c0_10 = arith.constant 0 : index
    %c0_11 = arith.constant 0 : index
    %11 = vector.load %arg7[%c0_10, %c0_11] : memref<64x1xf32, #tpu.memory_space<vmem>>, vector<64x1xf32>
    %12 = vector.broadcast %11 : vector<64x1xf32> to vector<64x144xf32>
    %13 = arith.addf %10, %12 : vector<64x144xf32>
    %c0_12 = arith.constant 0 : index
    %c0_13 = arith.constant 0 : index
    %14 = vector.load %arg8[%c0_12, %c0_13] : memref<64x1xf32, #tpu.memory_space<vmem>>, vector<64x1xf32>
    %c0_14 = arith.constant 0 : index
    %c0_15 = arith.constant 0 : index
    %c0_16 = arith.constant 0 : index
    %15 = vector.load %arg4[%c0_14, %c0_15, %c0_16] : memref<1x1x144xf32, #tpu.memory_space<vmem>>, vector<1x1x144xf32>
    %16 = vector.shape_cast %15 : vector<1x1x144xf32> to vector<1x144xf32>
    %17 = vector.broadcast %14 : vector<64x1xf32> to vector<64x144xf32>
    %18 = vector.broadcast %16 : vector<1x144xf32> to vector<64x144xf32>
    %19 = arith.mulf %17, %18 : vector<64x144xf32>
    %c0_17 = arith.constant 0 : index
    %c0_18 = arith.constant 0 : index
    %20 = vector.load %arg9[%c0_17, %c0_18] : memref<64x1xf32, #tpu.memory_space<vmem>>, vector<64x1xf32>
    %21 = vector.broadcast %20 : vector<64x1xf32> to vector<64x144xf32>
    %22 = arith.addf %19, %21 : vector<64x144xf32>
    %23 = arith.mulf %13, %22 : vector<64x144xf32>
    %c0_19 = arith.constant 0 : index
    %c0_20 = arith.constant 0 : index
    %c0_21 = arith.constant 0 : index
    %24 = vector.load %arg10[%c0_19, %c0_20, %c0_21] : memref<1x64x144xf32, #tpu.memory_space<vmem>>, vector<1x64x144xf32>
    %25 = vector.shape_cast %24 : vector<1x64x144xf32> to vector<64x144xf32>
    %26 = vector.shape_cast %23 : vector<64x144xf32> to vector<1x64x144xf32>
    tpu.vector_store %arg10[%c0_19, %c0_20, %c0_21], %26 {strides = array<i32>} : memref<1x64x144xf32, #tpu.memory_space<vmem>>, vector<1x64x144xf32>,
    return
  }
  func.func @transform_0(%arg0: i32, %arg1: i32) -> (i32, i32, i32) {
    %c0_i32 = arith.constant 0 : i32
    %c0_i32_0 = arith.constant 0 : i32
    return %arg0, %c0_i32, %arg1 : i32, i32, i32
  }
  func.func @transform_1(%arg0: i32, %arg1: i32) -> (i32, i32, i32) {
    %c0_i32 = arith.constant 0 : i32
    %c0_i32_0 = arith.constant 0 : i32
    return %arg0, %c0_i32, %arg1 : i32, i32, i32
  }
  func.func @transform_2(%arg0: i32, %arg1: i32) -> (i32, i32, i32) {
    %c0_i32 = arith.constant 0 : i32
    %c0_i32_0 = arith.constant 0 : i32
    return %arg0, %c0_i32, %arg1 : i32, i32, i32
  }
  func.func @transform_3(%arg0: i32, %arg1: i32) -> (i32, i32) {
    %c0_i32 = arith.constant 0 : i32
    %c0_i32_0 = arith.constant 0 : i32
    %c0_i32_1 = arith.constant 0 : i32
    return %c0_i32, %c0_i32_0 : i32, i32
  }
  func.func @transform_4(%arg0: i32, %arg1: i32) -> (i32, i32) {
    %c0_i32 = arith.constant 0 : i32
    %c0_i32_0 = arith.constant 0 : i32
    %c0_i32_1 = arith.constant 0 : i32
    return %c0_i32, %c0_i32_0 : i32, i32
  }
  func.func @transform_5(%arg0: i32, %arg1: i32) -> (i32, i32) {
    %c0_i32 = arith.constant 0 : i32
    %c0_i32_0 = arith.constant 0 : i32
    %c0_i32_1 = arith.constant 0 : i32
    return %c0_i32, %c0_i32_0 : i32, i32
  }
  func.func @transform_6(%arg0: i32, %arg1: i32) -> (i32, i32) {
    %c0_i32 = arith.constant 0 : i32
    %c0_i32_0 = arith.constant 0 : i32
    %c0_i32_1 = arith.constant 0 : i32
    return %c0_i32, %c0_i32_0 : i32, i32
  }
  func.func @transform_7(%arg0: i32, %arg1: i32) -> (i32, i32) {
    %c0_i32 = arith.constant 0 : i32
    %c0_i32_0 = arith.constant 0 : i32
    %c0_i32_1 = arith.constant 0 : i32
    return %c0_i32, %c0_i32_0 : i32, i32
  }
  func.func @transform_8(%arg0: i32, %arg1: i32) -> (i32, i32, i32) {
    %c0_i32 = arith.constant 0 : i32
    %c0_i32_0 = arith.constant 0 : i32
    return %arg0, %c0_i32, %arg1 : i32, i32, i32
  }
}

module attributes {stable_mosaic.version = 11 : i64} {
  func.func @_cfm_kernel(%arg0: i32, %arg1: i32, %arg2: memref<1x128x64xf32, #tpu.memory_space<vmem>>, %arg3: memref<1x128x64xf32, #tpu.memory_space<vmem>>, %arg4: memref<1x1x64xf32, #tpu.memory_space<vmem>>, %arg5: memref<128x128xbf16, #tpu.memory_space<vmem>>, %arg6: memref<128x128xbf16, #tpu.memory_space<vmem>>, %arg7: memref<128x1xf32, #tpu.memory_space<vmem>>, %arg8: memref<128x1xf32, #tpu.memory_space<vmem>>, %arg9: memref<128x1xf32, #tpu.memory_space<vmem>>, %arg10: memref<1x128x64xf32, #tpu.memory_space<vmem>>) attributes {dimension_semantics = [#tpu.dimension_semantics<parallel>, #tpu.dimension_semantics<parallel>], iteration_bounds = array<i64: 2, 1>, scalar_prefetch = 0 : i64, scratch_operands = 0 : i64, tpu.core_type = #tpu.core_type<tc>, window_params = [{transform_indices = @transform_0, window_bounds = array<i64: 1, 128, 64>}, {transform_indices = @transform_1, window_bounds = array<i64: 1, 128, 64>}, {transform_indices = @transform_2, window_bounds = array<i64: 1, 1, 64>}, {pipeline_mode = #tpu.pipeline_mode<synchronous>, transform_indices = @transform_3, window_bounds = array<i64: 128, 128>}, {pipeline_mode = #tpu.pipeline_mode<synchronous>, transform_indices = @transform_4, window_bounds = array<i64: 128, 128>}, {pipeline_mode = #tpu.pipeline_mode<synchronous>, transform_indices = @transform_5, window_bounds = array<i64: 128, 1>}, {pipeline_mode = #tpu.pipeline_mode<synchronous>, transform_indices = @transform_6, window_bounds = array<i64: 128, 1>}, {pipeline_mode = #tpu.pipeline_mode<synchronous>, transform_indices = @transform_7, window_bounds = array<i64: 128, 1>}, {transform_indices = @transform_8, window_bounds = array<i64: 1, 128, 64>}]} {
    %c0 = arith.constant 0 : index
    %c0_0 = arith.constant 0 : index
    %c0_1 = arith.constant 0 : index
    %0 = vector.load %arg2[%c0, %c0_0, %c0_1] : memref<1x128x64xf32, #tpu.memory_space<vmem>>, vector<1x128x64xf32>
    %1 = vector.shape_cast %0 : vector<1x128x64xf32> to vector<128x64xf32>
    %2 = arith.truncf %1 : vector<128x64xf32> to vector<128x64xbf16>
    %c0_2 = arith.constant 0 : index
    %c0_3 = arith.constant 0 : index
    %c0_4 = arith.constant 0 : index
    %3 = vector.load %arg3[%c0_2, %c0_3, %c0_4] : memref<1x128x64xf32, #tpu.memory_space<vmem>>, vector<1x128x64xf32>
    %4 = vector.shape_cast %3 : vector<1x128x64xf32> to vector<128x64xf32>
    %5 = arith.truncf %4 : vector<128x64xf32> to vector<128x64xbf16>
    %c0_5 = arith.constant 0 : index
    %c0_6 = arith.constant 0 : index
    %6 = vector.load %arg5[%c0_5, %c0_6] : memref<128x128xbf16, #tpu.memory_space<vmem>>, vector<128x128xbf16>
    %cst = arith.constant dense<0.000000e+00> : vector<128x64xf32>
    %7 = tpu.matmul %6, %2, %cst {dimension_numbers = #tpu.dot_dimension_numbers<[1], [0], [0], [1], [0, 0, 1, 1], [], []>} : vector<128x128xbf16>, vector<128x64xbf16>, vector<128x64xf32> -> vector<128x64xf32>
    %c0_7 = arith.constant 0 : index
    %c0_8 = arith.constant 0 : index
    %8 = vector.load %arg6[%c0_7, %c0_8] : memref<128x128xbf16, #tpu.memory_space<vmem>>, vector<128x128xbf16>
    %cst_9 = arith.constant dense<0.000000e+00> : vector<128x64xf32>
    %9 = tpu.matmul %8, %5, %cst_9 {dimension_numbers = #tpu.dot_dimension_numbers<[1], [0], [0], [1], [0, 0, 1, 1], [], []>} : vector<128x128xbf16>, vector<128x64xbf16>, vector<128x64xf32> -> vector<128x64xf32>
    %10 = arith.addf %7, %9 : vector<128x64xf32>
    %c0_10 = arith.constant 0 : index
    %c0_11 = arith.constant 0 : index
    %11 = vector.load %arg7[%c0_10, %c0_11] : memref<128x1xf32, #tpu.memory_space<vmem>>, vector<128x1xf32>
    %12 = vector.broadcast %11 : vector<128x1xf32> to vector<128x64xf32>
    %13 = arith.addf %10, %12 : vector<128x64xf32>
    %c0_12 = arith.constant 0 : index
    %c0_13 = arith.constant 0 : index
    %14 = vector.load %arg8[%c0_12, %c0_13] : memref<128x1xf32, #tpu.memory_space<vmem>>, vector<128x1xf32>
    %c0_14 = arith.constant 0 : index
    %c0_15 = arith.constant 0 : index
    %c0_16 = arith.constant 0 : index
    %15 = vector.load %arg4[%c0_14, %c0_15, %c0_16] : memref<1x1x64xf32, #tpu.memory_space<vmem>>, vector<1x1x64xf32>
    %16 = vector.shape_cast %15 : vector<1x1x64xf32> to vector<1x64xf32>
    %17 = vector.broadcast %14 : vector<128x1xf32> to vector<128x64xf32>
    %18 = vector.broadcast %16 : vector<1x64xf32> to vector<128x64xf32>
    %19 = arith.mulf %17, %18 : vector<128x64xf32>
    %c0_17 = arith.constant 0 : index
    %c0_18 = arith.constant 0 : index
    %20 = vector.load %arg9[%c0_17, %c0_18] : memref<128x1xf32, #tpu.memory_space<vmem>>, vector<128x1xf32>
    %21 = vector.broadcast %20 : vector<128x1xf32> to vector<128x64xf32>
    %22 = arith.addf %19, %21 : vector<128x64xf32>
    %23 = arith.mulf %13, %22 : vector<128x64xf32>
    %c0_19 = arith.constant 0 : index
    %c0_20 = arith.constant 0 : index
    %c0_21 = arith.constant 0 : index
    %24 = vector.load %arg10[%c0_19, %c0_20, %c0_21] : memref<1x128x64xf32, #tpu.memory_space<vmem>>, vector<1x128x64xf32>
    %25 = vector.shape_cast %24 : vector<1x128x64xf32> to vector<128x64xf32>
    %26 = vector.shape_cast %23 : vector<128x64xf32> to vector<1x128x64xf32>
    tpu.vector_store %arg10[%c0_19, %c0_20, %c0_21], %26 {strides = array<i32>} : memref<1x128x64xf32, #tpu.memory_space<vmem>>, vector<1x128x64xf32>,
    return
  }
  func.func @transform_0(%arg0: i32, %arg1: i32) -> (i32, i32, i32) {
    %c0_i32 = arith.constant 0 : i32
    %c0_i32_0 = arith.constant 0 : i32
    return %arg0, %c0_i32, %arg1 : i32, i32, i32
  }
  func.func @transform_1(%arg0: i32, %arg1: i32) -> (i32, i32, i32) {
    %c0_i32 = arith.constant 0 : i32
    %c0_i32_0 = arith.constant 0 : i32
    return %arg0, %c0_i32, %arg1 : i32, i32, i32
  }
  func.func @transform_2(%arg0: i32, %arg1: i32) -> (i32, i32, i32) {
    %c0_i32 = arith.constant 0 : i32
    %c0_i32_0 = arith.constant 0 : i32
    return %arg0, %c0_i32, %arg1 : i32, i32, i32
  }
  func.func @transform_3(%arg0: i32, %arg1: i32) -> (i32, i32) {
    %c0_i32 = arith.constant 0 : i32
    %c0_i32_0 = arith.constant 0 : i32
    %c0_i32_1 = arith.constant 0 : i32
    return %c0_i32, %c0_i32_0 : i32, i32
  }
  func.func @transform_4(%arg0: i32, %arg1: i32) -> (i32, i32) {
    %c0_i32 = arith.constant 0 : i32
    %c0_i32_0 = arith.constant 0 : i32
    %c0_i32_1 = arith.constant 0 : i32
    return %c0_i32, %c0_i32_0 : i32, i32
  }
  func.func @transform_5(%arg0: i32, %arg1: i32) -> (i32, i32) {
    %c0_i32 = arith.constant 0 : i32
    %c0_i32_0 = arith.constant 0 : i32
    %c0_i32_1 = arith.constant 0 : i32
    return %c0_i32, %c0_i32_0 : i32, i32
  }
  func.func @transform_6(%arg0: i32, %arg1: i32) -> (i32, i32) {
    %c0_i32 = arith.constant 0 : i32
    %c0_i32_0 = arith.constant 0 : i32
    %c0_i32_1 = arith.constant 0 : i32
    return %c0_i32, %c0_i32_0 : i32, i32
  }
  func.func @transform_7(%arg0: i32, %arg1: i32) -> (i32, i32) {
    %c0_i32 = arith.constant 0 : i32
    %c0_i32_0 = arith.constant 0 : i32
    %c0_i32_1 = arith.constant 0 : i32
    return %c0_i32, %c0_i32_0 : i32, i32
  }
  func.func @transform_8(%arg0: i32, %arg1: i32) -> (i32, i32, i32) {
    %c0_i32 = arith.constant 0 : i32
    %c0_i32_0 = arith.constant 0 : i32
    return %arg0, %c0_i32, %arg1 : i32, i32, i32
  }
}

module attributes {stable_mosaic.version = 11 : i64} {
  func.func @_cfm_kernel(%arg0: i32, %arg1: i32, %arg2: memref<1x32x256xf32, #tpu.memory_space<vmem>>, %arg3: memref<1x32x256xf32, #tpu.memory_space<vmem>>, %arg4: memref<1x1x256xf32, #tpu.memory_space<vmem>>, %arg5: memref<32x32xbf16, #tpu.memory_space<vmem>>, %arg6: memref<32x32xbf16, #tpu.memory_space<vmem>>, %arg7: memref<32x1xf32, #tpu.memory_space<vmem>>, %arg8: memref<32x1xf32, #tpu.memory_space<vmem>>, %arg9: memref<32x1xf32, #tpu.memory_space<vmem>>, %arg10: memref<1x32x256xf32, #tpu.memory_space<vmem>>) attributes {dimension_semantics = [#tpu.dimension_semantics<parallel>, #tpu.dimension_semantics<parallel>], iteration_bounds = array<i64: 2, 1>, scalar_prefetch = 0 : i64, scratch_operands = 0 : i64, tpu.core_type = #tpu.core_type<tc>, window_params = [{transform_indices = @transform_0, window_bounds = array<i64: 1, 32, 256>}, {transform_indices = @transform_1, window_bounds = array<i64: 1, 32, 256>}, {transform_indices = @transform_2, window_bounds = array<i64: 1, 1, 256>}, {pipeline_mode = #tpu.pipeline_mode<synchronous>, transform_indices = @transform_3, window_bounds = array<i64: 32, 32>}, {pipeline_mode = #tpu.pipeline_mode<synchronous>, transform_indices = @transform_4, window_bounds = array<i64: 32, 32>}, {pipeline_mode = #tpu.pipeline_mode<synchronous>, transform_indices = @transform_5, window_bounds = array<i64: 32, 1>}, {pipeline_mode = #tpu.pipeline_mode<synchronous>, transform_indices = @transform_6, window_bounds = array<i64: 32, 1>}, {pipeline_mode = #tpu.pipeline_mode<synchronous>, transform_indices = @transform_7, window_bounds = array<i64: 32, 1>}, {transform_indices = @transform_8, window_bounds = array<i64: 1, 32, 256>}]} {
    %c0 = arith.constant 0 : index
    %c0_0 = arith.constant 0 : index
    %c0_1 = arith.constant 0 : index
    %0 = vector.load %arg2[%c0, %c0_0, %c0_1] : memref<1x32x256xf32, #tpu.memory_space<vmem>>, vector<1x32x256xf32>
    %1 = vector.shape_cast %0 : vector<1x32x256xf32> to vector<32x256xf32>
    %2 = arith.truncf %1 : vector<32x256xf32> to vector<32x256xbf16>
    %c0_2 = arith.constant 0 : index
    %c0_3 = arith.constant 0 : index
    %c0_4 = arith.constant 0 : index
    %3 = vector.load %arg3[%c0_2, %c0_3, %c0_4] : memref<1x32x256xf32, #tpu.memory_space<vmem>>, vector<1x32x256xf32>
    %4 = vector.shape_cast %3 : vector<1x32x256xf32> to vector<32x256xf32>
    %5 = arith.truncf %4 : vector<32x256xf32> to vector<32x256xbf16>
    %c0_5 = arith.constant 0 : index
    %c0_6 = arith.constant 0 : index
    %6 = vector.load %arg5[%c0_5, %c0_6] : memref<32x32xbf16, #tpu.memory_space<vmem>>, vector<32x32xbf16>
    %cst = arith.constant dense<0.000000e+00> : vector<32x256xf32>
    %7 = tpu.matmul %6, %2, %cst {dimension_numbers = #tpu.dot_dimension_numbers<[1], [0], [0], [1], [0, 0, 1, 1], [], []>} : vector<32x32xbf16>, vector<32x256xbf16>, vector<32x256xf32> -> vector<32x256xf32>
    %c0_7 = arith.constant 0 : index
    %c0_8 = arith.constant 0 : index
    %8 = vector.load %arg6[%c0_7, %c0_8] : memref<32x32xbf16, #tpu.memory_space<vmem>>, vector<32x32xbf16>
    %cst_9 = arith.constant dense<0.000000e+00> : vector<32x256xf32>
    %9 = tpu.matmul %8, %5, %cst_9 {dimension_numbers = #tpu.dot_dimension_numbers<[1], [0], [0], [1], [0, 0, 1, 1], [], []>} : vector<32x32xbf16>, vector<32x256xbf16>, vector<32x256xf32> -> vector<32x256xf32>
    %10 = arith.addf %7, %9 : vector<32x256xf32>
    %c0_10 = arith.constant 0 : index
    %c0_11 = arith.constant 0 : index
    %11 = vector.load %arg7[%c0_10, %c0_11] : memref<32x1xf32, #tpu.memory_space<vmem>>, vector<32x1xf32>
    %12 = vector.broadcast %11 : vector<32x1xf32> to vector<32x256xf32>
    %13 = arith.addf %10, %12 : vector<32x256xf32>
    %c0_12 = arith.constant 0 : index
    %c0_13 = arith.constant 0 : index
    %14 = vector.load %arg8[%c0_12, %c0_13] : memref<32x1xf32, #tpu.memory_space<vmem>>, vector<32x1xf32>
    %c0_14 = arith.constant 0 : index
    %c0_15 = arith.constant 0 : index
    %c0_16 = arith.constant 0 : index
    %15 = vector.load %arg4[%c0_14, %c0_15, %c0_16] : memref<1x1x256xf32, #tpu.memory_space<vmem>>, vector<1x1x256xf32>
    %16 = vector.shape_cast %15 : vector<1x1x256xf32> to vector<1x256xf32>
    %17 = vector.broadcast %14 : vector<32x1xf32> to vector<32x256xf32>
    %18 = vector.broadcast %16 : vector<1x256xf32> to vector<32x256xf32>
    %19 = arith.mulf %17, %18 : vector<32x256xf32>
    %c0_17 = arith.constant 0 : index
    %c0_18 = arith.constant 0 : index
    %20 = vector.load %arg9[%c0_17, %c0_18] : memref<32x1xf32, #tpu.memory_space<vmem>>, vector<32x1xf32>
    %21 = vector.broadcast %20 : vector<32x1xf32> to vector<32x256xf32>
    %22 = arith.addf %19, %21 : vector<32x256xf32>
    %23 = arith.mulf %13, %22 : vector<32x256xf32>
    %c0_19 = arith.constant 0 : index
    %c0_20 = arith.constant 0 : index
    %c0_21 = arith.constant 0 : index
    %24 = vector.load %arg10[%c0_19, %c0_20, %c0_21] : memref<1x32x256xf32, #tpu.memory_space<vmem>>, vector<1x32x256xf32>
    %25 = vector.shape_cast %24 : vector<1x32x256xf32> to vector<32x256xf32>
    %26 = vector.shape_cast %23 : vector<32x256xf32> to vector<1x32x256xf32>
    tpu.vector_store %arg10[%c0_19, %c0_20, %c0_21], %26 {strides = array<i32>} : memref<1x32x256xf32, #tpu.memory_space<vmem>>, vector<1x32x256xf32>,
    return
  }
  func.func @transform_0(%arg0: i32, %arg1: i32) -> (i32, i32, i32) {
    %c0_i32 = arith.constant 0 : i32
    %c0_i32_0 = arith.constant 0 : i32
    return %arg0, %c0_i32, %arg1 : i32, i32, i32
  }
  func.func @transform_1(%arg0: i32, %arg1: i32) -> (i32, i32, i32) {
    %c0_i32 = arith.constant 0 : i32
    %c0_i32_0 = arith.constant 0 : i32
    return %arg0, %c0_i32, %arg1 : i32, i32, i32
  }
  func.func @transform_2(%arg0: i32, %arg1: i32) -> (i32, i32, i32) {
    %c0_i32 = arith.constant 0 : i32
    %c0_i32_0 = arith.constant 0 : i32
    return %arg0, %c0_i32, %arg1 : i32, i32, i32
  }
  func.func @transform_3(%arg0: i32, %arg1: i32) -> (i32, i32) {
    %c0_i32 = arith.constant 0 : i32
    %c0_i32_0 = arith.constant 0 : i32
    %c0_i32_1 = arith.constant 0 : i32
    return %c0_i32, %c0_i32_0 : i32, i32
  }
  func.func @transform_4(%arg0: i32, %arg1: i32) -> (i32, i32) {
    %c0_i32 = arith.constant 0 : i32
    %c0_i32_0 = arith.constant 0 : i32
    %c0_i32_1 = arith.constant 0 : i32
    return %c0_i32, %c0_i32_0 : i32, i32
  }
  func.func @transform_5(%arg0: i32, %arg1: i32) -> (i32, i32) {
    %c0_i32 = arith.constant 0 : i32
    %c0_i32_0 = arith.constant 0 : i32
    %c0_i32_1 = arith.constant 0 : i32
    return %c0_i32, %c0_i32_0 : i32, i32
  }
  func.func @transform_6(%arg0: i32, %arg1: i32) -> (i32, i32) {
    %c0_i32 = arith.constant 0 : i32
    %c0_i32_0 = arith.constant 0 : i32
    %c0_i32_1 = arith.constant 0 : i32
    return %c0_i32, %c0_i32_0 : i32, i32
  }
  func.func @transform_7(%arg0: i32, %arg1: i32) -> (i32, i32) {
    %c0_i32 = arith.constant 0 : i32
    %c0_i32_0 = arith.constant 0 : i32
    %c0_i32_1 = arith.constant 0 : i32
    return %c0_i32, %c0_i32_0 : i32, i32
  }
  func.func @transform_8(%arg0: i32, %arg1: i32) -> (i32, i32, i32) {
    %c0_i32 = arith.constant 0 : i32
    %c0_i32_0 = arith.constant 0 : i32
    return %arg0, %c0_i32, %arg1 : i32, i32, i32
  }
}

</mosaic_0001>

<bundles_post_ra>
// kernel: cross_feature_module.4
= control target key start
LH: loop header
LB: loop body
LE: loop exit
PB: predicated region body
PF: predicated region fallthrough
CT: control target
= control target key end

     0   :  { %s1185_s27 = smov 0   ;;  %s1187_s28 = smov 0   ;;  %s1469_s0 = inlined_call_operand.vmem [shape: f32[2,64,144], index: 0, kind: input, shape index: {}]   ;;  %s1470_s1 = inlined_call_operand.vmem [shape: f32[2,64,144], index: 1, kind: input, shape index: {}]   ;;  %s1471_s2 = inlined_call_operand.vmem [shape: f32[2,1,144], index: 2, kind: input, shape index: {}]   ;;  %s1472_s3 = inlined_call_operand.vmem [shape: bf16[64,64], index: 3, kind: input, shape index: {}]   ;;  %s1473_s4 = inlined_call_operand.vmem [shape: bf16[64,64], index: 4, kind: input, shape index: {}]   ;;  %s1474_s5 = inlined_call_operand.vmem [shape: f32[64,1], index: 5, kind: input, shape index: {}]   ;;  %s1475_s6 = inlined_call_operand.vmem [shape: f32[64,1], index: 6, kind: input, shape index: {}]   ;;  %s1476_s7 = inlined_call_operand.vmem [shape: f32[64,1], index: 7, kind: input, shape index: {}]   ;;  %s1477_s8 = inlined_call_operand.vmem [shape: f32[2,64,144], index: 8, kind: output, shape index: {}]  }
   0x1   :  { %s1189_s29 = smov 0  }
   0x2 LB: > { %s30_s30 = sadd.s32 1, %s1133_s28  ;;  %p1051_p0 = scmp.ge.s32.totalorder %s1137_s29, 1  ;;  %s1137_s29 = sphi %s1189_s29, %s18_s29   ;;  %s1133_s28 = sphi %s1187_s28, %s1479_s28   ;;  %s1129_s27 = sphi %s1185_s27, %s1478_s27  }
   0x3   : > { %p32_p1 = scmp.ge.s32.totalorder %s30_s30, 2  ;;  %p316_p2 = scmp.lt.s32.totalorder %s1137_s29, 3 }
   0x5   : > { %s1481_s30 = smov (%p32_p1, %s30_s30), 0  ;;  %p317_p3 = pnand %p1051_p0, %p316_p2 }
   0x6   : > { %p376_p4 = scmp.lt.s32.totalorder (!%p317_p3), %s1129_s27, 1 }
   0x7   : > { %320 = sbr.rel (%p317_p3) target bundleno = 265 (0x109), region = 52 }
   0xc   : > { %v1139_v0 = vmov 0   ;;  %s1483_s27 = smov (!%p376_p4, %s1129_s27), 1  ;;  %v692_v1 = vld [vmem:[%s1474_s5 + $0x10] sm:$0xff]  ;;  %v690_v2 = vld [vmem:[%s1474_s5] sm:$0xff]  ;;  %v693_v49 = vld [vmem:[%s1474_s5 + $0x18] sm:$0xff]  ;;  %vm499_vm0 = vcmask 523264  }
   0xd   : > { %544 = vmatprep.mubr.bf16.mxu0 %v1139_v0  ;;  %649 = vmatprep.mubr.bf16.mxu1 %v1139_v0  ;;  %s1210_s9 = sshll.u32 %s1483_s27, 7  ;;  %v691_v51 = vld [vmem:[%s1474_s5 + $0x8] sm:$0xff]  ;;  %v1107_v54 = vld [vmem:[%s1473_s4] sm:$0xff]   ;;  %v696_v58 = vld [vmem:[%s1474_s5 + $0x30] sm:$0xff]  ;;  %s1056_s12 = sshll.u32 %s1483_s27, 1  ;;  %vm911_vm1 = vcmask 130048  }
   0xe   : > { %1106 = vset.pattern.permute.xlu1 %v1139_v0  ;;  %1105 = vset.pattern.permute.xlu0 %v1139_v0  ;;  %s1222_s16 = scalar_lea.vmem %s1470_s1, %s1210_s9  ;;  %s1230_s19 = scalar_lea.vmem %s1469_s0, %s1210_s9  ;;  %v695_v53 = vld [vmem:[%s1474_s5 + $0x28] sm:$0xff]  ;;  %v694_v55 = vld [vmem:[%s1474_s5 + $0x20] sm:$0xff]  ;;  %v756_v59 = vld [vmem:[%s1475_s6 + $0x10] sm:$0xff] }
   0xf   : > { %710 = vperm.xlu1 %1106, %v692_v1   ;;  %700 = vperm.xlu0 %1105, %v690_v2   ;;  %v452_v3 = vld [vmem:[%s1222_s16 + $0x68] sm:$0xff]  ;;  %v454_v4 = vld [vmem:[%s1222_s16 + $0x78] sm:$0xff]  ;;  %v451_v5 = vld [vmem:[%s1222_s16 + $0x60] sm:$0xff]  ;;  %s402_s15 = scalar_lea.vmem %s1471_s2, %s1056_s12  ;;  %s1401_s17 = scalar_lea.vmem %s1477_s8, %s1210_s9 }
  0x10   : > { %v462_v6 = vpack.c.bf16 %v454_v4, %v452_v3  ;;  %v428_v7 = vld [vmem:[%s1230_s19 + $0x68] sm:$0xff]  ;;  %v430_v8 = vld [vmem:[%s1230_s19 + $0x78] sm:$0xff]  ;;  %v453_v9 = vld [vmem:[%s1222_s16 + $0x70] sm:$0xff] }
  0x11   : > { %v438_v10 = vpack.c.bf16 %v430_v8, %v428_v7  ;;  %v461_v11 = vpack.c.bf16 %v453_v9, %v451_v5  ;;  %v427_v12 = vld [vmem:[%s1230_s19 + $0x60] sm:$0xff]  ;;  %v429_v13 = vld [vmem:[%s1230_s19 + $0x70] sm:$0xff]  ;;  %v448_v14 = vld [vmem:[%s1222_s16 + $0x48] sm:$0xff] }
  0x12   : > { %520 = vmatprep.subr.bf16.mxu0 %v462_v6  ;;  %v437_v15 = vpack.c.bf16 %v429_v13, %v427_v12  ;;  %v450_v16 = vld [vmem:[%s1222_s16 + $0x58] sm:$0xff]  ;;  %v424_v17 = vld [vmem:[%s1230_s19 + $0x48] sm:$0xff]  ;;  %v447_v21 = vld [vmem:[%s1222_s16 + $0x40] sm:$0xff] }
  0x13   : > { %v426_v18 = vld [vmem:[%s1230_s19 + $0x58] sm:$0xff]  ;;  %625 = vmatprep.subr.bf16.mxu1 %v438_v10  ;;  %521 = vmatpush1.bf16.msra.mxu0 %v461_v11  ;;  %v460_v19 = vpack.c.bf16 %v450_v16, %v448_v14  ;;  %v449_v22 = vld [vmem:[%s1222_s16 + $0x50] sm:$0xff]  ;;  %v423_v23 = vld [vmem:[%s1230_s19 + $0x40] sm:$0xff] }
  0x14   : > { %v436_v20 = vpack.c.bf16 %v426_v18, %v424_v17  ;;  %626 = vmatpush1.bf16.msra.mxu1 %v437_v15  ;;  %v459_v24 = vpack.c.bf16 %v449_v22, %v447_v21  ;;  %v425_v25 = vld [vmem:[%s1230_s19 + $0x50] sm:$0xff]  ;;  %v444_v26 = vld [vmem:[%s1222_s16 + $0x28] sm:$0xff]  ;;  %v446_v27 = vld [vmem:[%s1222_s16 + $0x38] sm:$0xff]  ;;  %715 = vperm.xlu1 %1106, %v693_v49  }
  0x15   : > { %522 = vmatprep.subr.bf16.mxu0 %v460_v19  ;;  %v435_v28 = vpack.c.bf16 %v425_v25, %v423_v23  ;;  %v458_v29 = vpack.c.bf16 %v446_v27, %v444_v26  ;;  %v420_v30 = vld [vmem:[%s1230_s19 + $0x28] sm:$0xff]  ;;  %v422_v31 = vld [vmem:[%s1230_s19 + $0x38] sm:$0xff]  ;;  %v443_v32 = vld [vmem:[%s1222_s16 + $0x20] sm:$0xff]  ;;  %705 = vperm.xlu0 %1105, %v691_v51   ;;  %v804_v27 = vlaneseq }
  0x16   : > { %627 = vmatprep.subr.bf16.mxu1 %v436_v20  ;;  %v434_v33 = vpack.c.bf16 %v422_v31, %v420_v30  ;;  %v445_v34 = vld [vmem:[%s1222_s16 + $0x30] sm:$0xff]  ;;  %v419_v35 = vld [vmem:[%s1230_s19 + $0x20] sm:$0xff]  ;;  %v440_v38 = vld [vmem:[%s1222_s16 + $0x8] sm:$0xff] }
  0x17   : > { %v421_v36 = vld [vmem:[%s1230_s19 + $0x30] sm:$0xff]  ;;  %523 = vmatpush1.bf16.msra.mxu0 %v459_v24  ;;  %v457_v37 = vpack.c.bf16 %v445_v34, %v443_v32  ;;  %v442_v39 = vld [vmem:[%s1222_s16 + $0x18] sm:$0xff]  ;;  %v416_v40 = vld [vmem:[%s1230_s19 + $0x8] sm:$0xff] }
  0x18   : > { %628 = vmatpush1.bf16.msra.mxu1 %v435_v28  ;;  %524 = vmatprep.subr.bf16.mxu0 %v458_v29  ;;  %v433_v41 = vpack.c.bf16 %v421_v36, %v419_v35  ;;  %v456_v42 = vpack.c.bf16 %v442_v39, %v440_v38  ;;  %v418_v43 = vld [vmem:[%s1230_s19 + $0x18] sm:$0xff]  ;;  %v439_v44 = vld [vmem:[%s1222_s16] sm:$0xff]  ;;  %v441_v45 = vld [vmem:[%s1222_s16 + $0x10] sm:$0xff]  ;;  %v805_v29 = vshrl.u32 %v804_v27, 7 }
  0x19   : > { %629 = vmatprep.subr.bf16.mxu1 %v434_v33  ;;  %v432_v46 = vpack.c.bf16 %v418_v43, %v416_v40  ;;  %v415_v47 = vld [vmem:[%s1230_s19] sm:$0xff]  ;;  %v417_v48 = vld [vmem:[%s1230_s19 + $0x10] sm:$0xff]  ;;  %v455_v50 = vpack.c.bf16 %v441_v45, %v439_v44  ;;  %725 = vperm.xlu1 %1106, %v695_v53   ;;  %v1109_v60 = vld [vmem:[%s1473_s4 + $0x8] sm:$0xff]  }
  0x1a   : > { %v431_v52 = vpack.c.bf16 %v417_v48, %v415_v47  ;;  %v1108_v56 = vld [vmem:[%s1472_s3] sm:$0xff]   ;;  %720 = vperm.xlu0 %1105, %v694_v55   ;;  %v755_v61 = vld [vmem:[%s1475_s6 + $0x8] sm:$0xff]  ;;  %v757_v1 = vld [vmem:[%s1475_s6 + $0x18] sm:$0xff]  ;;  %v806_v32 = vsub.s32 0, %v805_v29  ;;  %v810_v34 = vsub.s32 1, %v805_v29 }
  0x1b   : > { %525 = vmatpush1.bf16.msra.mxu0 %v457_v37  ;;  %v754_v57 = vld [vmem:[%s1475_s6] sm:$0xff]  ;;  %v1110_v62 = vld [vmem:[%s1472_s3 + $0x8] sm:$0xff]   ;;  %v760_v2 = vld [vmem:[%s1475_s6 + $0x30] sm:$0xff] }
  0x1c   : > { %630 = vmatpush1.bf16.msra.mxu1 %v433_v41  ;;  %526 = vmatprep.subr.bf16.mxu0 %v456_v42  ;;  %v758_v63 = vld [vmem:[%s1475_s6 + $0x20] sm:$0xff]  ;;  %v1111_v3 = vld [vmem:[%s1473_s4 + $0x10] sm:$0xff]   ;;  %v759_v4 = vld [vmem:[%s1475_s6 + $0x28] sm:$0xff] }
  0x1d   : > { %631 = vmatprep.subr.bf16.mxu1 %v432_v46  ;;  %765 = vperm.xlu1 %1106, %v754_v57   ;;  %v1112_v5 = vld [vmem:[%s1472_s3 + $0x10] sm:$0xff]   ;;  %v697_v6 = vld [vmem:[%s1474_s5 + $0x38] sm:$0xff]  ;;  %v831_v8 = vld [vmem:[%s1476_s7 + $0x8] sm:$0xff] }
  0x1e   : > { %730 = vperm.xlu0 %1105, %v696_v58   ;;  %v761_v7 = vld [vmem:[%s1475_s6 + $0x38] sm:$0xff]  ;;  %v830_v10 = vld [vmem:[%s1476_s7] sm:$0xff]  ;;  %v832_v12 = vld [vmem:[%s1476_s7 + $0x10] sm:$0xff] }
  0x1f   : > { %527 = vmatpush1.bf16.msra.mxu0 %v455_v50  ;;  %v1113_v9 = vld [vmem:[%s1473_s4 + $0x18] sm:$0xff]   ;;  %v835_v13 = vld [vmem:[%s1476_s7 + $0x28] sm:$0xff]  ;;  %v834_v14 = vld [vmem:[%s1476_s7 + $0x20] sm:$0xff] }
  0x20   : > { %632 = vmatpush1.bf16.msra.mxu1 %v431_v52  ;;  %v1114_v11 = vld [vmem:[%s1472_s3 + $0x18] sm:$0xff]   ;;  %v836_v16 = vld [vmem:[%s1476_s7 + $0x30] sm:$0xff]  ;;  %v762_v33 = vld [vmem:[%s402_s15] sm:$0x3] }
  0x21   : > { %775 = vperm.xlu1 %1106, %v756_v59   ;;  %v837_v15 = vld [vmem:[%s1476_s7 + $0x38] sm:$0xff]  ;;  %v1386_v36 = vrot.slane %v762_v33, %v806_v32  ;;  %v1390_v38 = vrot.slane %v762_v33, %v810_v34 }
  0x22   : > { %1063 = vmatmul.mubr.msk.bf16.vlgmr.msra.gmra.mxu0 %vm499_vm0, %v1107_v54  ;;  %770 = vperm.xlu0 %1105, %v755_v61  }
  0x23   : > { %1071 = vmatmul.mubr.msk.bf16.vlgmr.msra.gmra.mxu1 %vm499_vm0, %v1108_v56  ;;  %554 = vmatprep.mubr.bf16.mxu0 %v1139_v0 }
  0x24   : > { %659 = vmatprep.mubr.bf16.mxu1 %v1139_v0 }
  0x25   : > { %785 = vperm.xlu1 %1106, %v758_v63  }
  0x26   : > { %780 = vperm.xlu0 %1105, %v757_v1  }
  0x29   : > { %795 = vperm.xlu1 %1106, %v760_v2  }
  0x2a   : > { %1064 = vmatmul.mubr.msk.bf16.gmra.mxu0 %vm499_vm0, %v1109_v60  ;;  %790 = vperm.xlu0 %1105, %v759_v4  }
  0x2b   : > { %1072 = vmatmul.mubr.msk.bf16.gmra.mxu1 %vm499_vm0, %v1110_v62  ;;  %564 = vmatprep.mubr.bf16.mxu0 %v1139_v0 }
  0x2c   : > { %669 = vmatprep.mubr.bf16.mxu1 %v1139_v0 }
  0x2d   : > { %735 = vperm.xlu1 %1106, %v697_v6  }
  0x2e   : > { %800 = vperm.xlu0 %1105, %v761_v7  }
  0x31   : > { %845 = vperm.xlu1 %1106, %v831_v8  }
  0x32   : > { %1065 = vmatmul.mubr.msk.bf16.gmra.mxu0 %vm499_vm0, %v1111_v3  ;;  %840 = vperm.xlu0 %1105, %v830_v10  }
  0x33   : > { %1073 = vmatmul.mubr.msk.bf16.gmra.mxu1 %vm499_vm0, %v1112_v5  ;;  %574 = vmatprep.mubr.bf16.mxu0 %v1139_v0 }
  0x34   : > { %679 = vmatprep.mubr.bf16.mxu1 %v1139_v0  ;;  %v833_v0 = vld [vmem:[%s1476_s7 + $0x18] sm:$0xff] }
  0x35   : > { %855 = vperm.xlu1 %1106, %v833_v0  }
  0x36   : > { %850 = vperm.xlu0 %1105, %v832_v12  }
  0x39   : > { %865 = vperm.xlu1 %1106, %v835_v13  }
  0x3a   : > { %1066 = vmatmul.mubr.msk.bf16.gmra.mxu0 %vm499_vm0, %v1113_v9  ;;  %860 = vperm.xlu0 %1105, %v834_v14  }
  0x3b   : > { %1074 = vmatmul.mubr.msk.bf16.gmra.mxu1 %vm499_vm0, %v1114_v11 }
  0x3d   : > { %875 = vperm.xlu1 %1106, %v837_v15  }
  0x3e   : > { %870 = vperm.xlu0 %1105, %v836_v16  }
  0x8a   : > { %v701_v17 = vpop.permute.xlu0 %700  ;;  %v1366_v18 = vpop.permute.xlu1 %710 }
  0x8f   : > { %v1368_v20 = vpop.permute.xlu1 %715 }
  0x90   : > { %v706_v19 = vpop.permute.xlu0 %705 }
  0x94   : > { %v1372_v22 = vpop.permute.xlu1 %725 }
  0x95   : > { %v1370_v21 = vpop.permute.xlu0 %720 }
  0x98   : > { %v766_v24 = vpop.permute.xlu1 %765 }
  0x99   : > { %v1374_v23 = vpop.permute.xlu0 %730  ;;  %v814_v39 = vmul.f32 %v1386_v36, %v766_v24  ;;  %v815_v43 = vmul.f32 %v1390_v38, %v766_v24 }
  0x9c   : > { %v776_v26 = vpop.permute.xlu1 %775 }
  0x9d   : > { %v771_v25 = vpop.permute.xlu0 %770  ;;  %v818_v60 = vmul.f32 %v1386_v36, %v776_v26  ;;  %v819_v5 = vmul.f32 %v1390_v38, %v776_v26 }
  0x9e   : > { %v816_v48 = vmul.f32 %v1386_v36, %v771_v25  ;;  %v817_v53 = vmul.f32 %v1390_v38, %v771_v25 }
  0xa0   : > { %v1377_v30 = vpop.permute.xlu1 %785 }
  0xa1   : > { %v781_v28 = vpop.permute.xlu0 %780  ;;  %v822_v34 = vmul.f32 %v1386_v36, %v1377_v30 }
  0xa2   : > { %v820_v0 = vmul.f32 %v1386_v36, %v781_v28  ;;  %v821_v25 = vmul.f32 %v1390_v38, %v781_v28 }
  0xa4   : > { %v1384_v35 = vpop.permute.xlu1 %795 }
  0xa5   : > { %v1382_v31 = vpop.permute.xlu0 %790 }
  0xa8   : > { %v1393_v41 = vpop.permute.xlu1 %735 }
  0xa9   : > { %v1388_v37 = vpop.permute.xlu0 %800 }
  0xac   : > { %v846_v61 = vpop.permute.xlu1 %845 }
  0xad   : > { %v841_v46 = vpop.permute.xlu0 %840  ;;  %v880_v63 = vadd.f32 %v846_v61, %v816_v48  ;;  %v881_v7 = vadd.f32 %v846_v61, %v817_v53 }
  0xae   : > { %v878_v49 = vadd.f32 %v841_v46, %v814_v39  ;;  %v879_v55 = vadd.f32 %v841_v46, %v815_v43  ;;  %v823_v46 = vmul.f32 %v1390_v38, %v1377_v30 }
  0xb0   : > { %v856_v39 = vpop.permute.xlu1 %855 }
  0xb1   : > { %v851_v12 = vpop.permute.xlu0 %850 }
  0xb2   : > { %v882_v14 = vadd.f32 %v851_v12, %v818_v60  ;;  %v883_v27 = vadd.f32 %v851_v12, %v819_v5 }
  0xb5   : > { %v861_v53 = vpop.permute.xlu0 %860 }
  0xe2   : > { %v546_v40 = vpop.f32.mrf.mxu0 }
  0xe3   : > { %v651_v42 = vpop.f32.mrf.mxu1 }
  0xe4   : > { %v652_v44 = vadd.f32 %v651_v42, %v546_v40  ;;  %v548_v45 = vpop.f32.mrf.mxu0  ;;  %v884_v42 = vadd.f32 %v856_v39, %v820_v0 }
  0xe5   : > { %v653_v47 = vpop.f32.mrf.mxu1 }
  0xe6   : > { %v738_v50 = vadd.f32 %v701_v17, %v652_v44  ;;  %v654_v51 = vadd.f32 %v653_v47, %v548_v45  ;;  %v550_v52 = vpop.f32.mrf.mxu0 }
  0xe7   : > { %v655_v54 = vpop.f32.mrf.mxu1 }
  0xe8   : > { %v894_v56 = vmul.f32 %v878_v49, %v738_v50  ;;  %v739_v57 = vadd.f32 %v701_v17, %v654_v51  ;;  %v656_v58 = vadd.f32 %v655_v54, %v550_v52  ;;  %v552_v59 = vpop.f32.mrf.mxu0  ;;  %v824_v52 = vmul.f32 %v1386_v36, %v1382_v31 }
  0xe9   : > { %v657_v62 = vpop.f32.mrf.mxu1 }
  0xea   : > { %910 = vst [vmem:[%s1401_s17] sm:$0xff] %v894_v56  ;;  %v895_v1 = vmul.f32 %v879_v55, %v739_v57  ;;  %v740_v2 = vadd.f32 %v706_v19, %v656_v58  ;;  %v658_v3 = vadd.f32 %v657_v62, %v552_v59  ;;  %v556_v4 = vpop.f32.mrf.mxu0  ;;  %v886_v55 = vadd.f32 %v861_v53, %v822_v34 }
  0xeb   : > { %v661_v6 = vpop.f32.mrf.mxu1  ;;  %v825_v59 = vmul.f32 %v1390_v38, %v1382_v31 }
  0xec   : > { %912 = vst.msk [vmem:[%s1401_s17 + $0x8] sm:$0xff] %vm911_vm1, %v895_v1  ;;  %v896_v8 = vmul.f32 %v880_v63, %v740_v2  ;;  %v741_v9 = vadd.f32 %v706_v19, %v658_v3  ;;  %v662_v10 = vadd.f32 %v661_v6, %v556_v4  ;;  %v558_v11 = vpop.f32.mrf.mxu0  ;;  %v826_v2 = vmul.f32 %v1386_v36, %v1384_v35  ;;  %v866_v3 = vpop.permute.xlu1 %865 }
  0xed   : > { %v663_v13 = vpop.f32.mrf.mxu1  ;;  %v888_v5 = vadd.f32 %v866_v3, %v824_v52 }
  0xee   : > { %913 = vst [vmem:[%s1401_s17 + $0x10] sm:$0xff] %v896_v8  ;;  %v897_v15 = vmul.f32 %v881_v7, %v741_v9  ;;  %v742_v16 = vadd.f32 %v1366_v18, %v662_v10  ;;  %v664_v17 = vadd.f32 %v663_v13, %v558_v11  ;;  %v560_v24 = vpop.f32.mrf.mxu0  ;;  %v827_v9 = vmul.f32 %v1390_v38, %v1384_v35 }
  0xef   : > { %v665_v26 = vpop.f32.mrf.mxu1  ;;  %v889_v11 = vadd.f32 %v866_v3, %v825_v59 }
  0xf0   : > { %914 = vst.msk [vmem:[%s1401_s17 + $0x18] sm:$0xff] %vm911_vm1, %v897_v15  ;;  %v898_v19 = vmul.f32 %v882_v14, %v742_v16  ;;  %v743_v29 = vadd.f32 %v1366_v18, %v664_v17  ;;  %v666_v32 = vadd.f32 %v665_v26, %v560_v24  ;;  %v562_v33 = vpop.f32.mrf.mxu0  ;;  %v885_v18 = vadd.f32 %v856_v39, %v821_v25 }
  0xf1   : > { %v667_v40 = vpop.f32.mrf.mxu1  ;;  %v828_v15 = vmul.f32 %v1386_v36, %v1388_v37 }
  0xf2   : > { %915 = vst [vmem:[%s1401_s17 + $0x20] sm:$0xff] %v898_v19  ;;  %v899_v43 = vmul.f32 %v883_v27, %v743_v29  ;;  %v744_v28 = vadd.f32 %v1368_v20, %v666_v32  ;;  %v668_v44 = vadd.f32 %v667_v40, %v562_v33  ;;  %v566_v45 = vpop.f32.mrf.mxu0  ;;  %v829_v27 = vmul.f32 %v1390_v38, %v1388_v37  ;;  %v876_v19 = vpop.permute.xlu1 %875 }
  0xf3   : > { %v671_v47 = vpop.f32.mrf.mxu1  ;;  %v892_v40 = vadd.f32 %v876_v19, %v828_v15 }
  0xf4   : > { %916 = vst.msk [vmem:[%s1401_s17 + $0x28] sm:$0xff] %vm911_vm1, %v899_v43  ;;  %v900_v48 = vmul.f32 %v884_v42, %v744_v28  ;;  %v745_v49 = vadd.f32 %v1368_v20, %v668_v44  ;;  %v672_v50 = vadd.f32 %v671_v47, %v566_v45  ;;  %v568_v51 = vpop.f32.mrf.mxu0  ;;  %v887_v20 = vadd.f32 %v861_v53, %v823_v46 }
  0xf5   : > { %v673_v54 = vpop.f32.mrf.mxu1  ;;  %v893_v38 = vadd.f32 %v876_v19, %v829_v27 }
  0xf6   : > { %917 = vst [vmem:[%s1401_s17 + $0x30] sm:$0xff] %v900_v48  ;;  %v901_v56 = vmul.f32 %v885_v18, %v745_v49  ;;  %v746_v30 = vadd.f32 %v1370_v21, %v672_v50  ;;  %v674_v57 = vadd.f32 %v673_v54, %v568_v51  ;;  %v570_v58 = vpop.f32.mrf.mxu0 }
  0xf7   : > { %v675_v60 = vpop.f32.mrf.mxu1 }
  0xf8   : > { %918 = vst.msk [vmem:[%s1401_s17 + $0x38] sm:$0xff] %vm911_vm1, %v901_v56  ;;  %v902_v61 = vmul.f32 %v886_v55, %v746_v30  ;;  %v747_v62 = vadd.f32 %v1370_v21, %v674_v57  ;;  %v676_v63 = vadd.f32 %v675_v60, %v570_v58  ;;  %v572_v1 = vpop.f32.mrf.mxu0  ;;  %v871_v21 = vpop.permute.xlu0 %870 }
  0xf9   : > { %v677_v4 = vpop.f32.mrf.mxu1  ;;  %v890_v17 = vadd.f32 %v871_v21, %v826_v2  ;;  %v891_v29 = vadd.f32 %v871_v21, %v827_v9 }
  0xfa   : > { %919 = vst [vmem:[%s1401_s17 + $0x40] sm:$0xff] %v902_v61  ;;  %v903_v6 = vmul.f32 %v887_v20, %v747_v62  ;;  %v748_v31 = vadd.f32 %v1372_v22, %v676_v63  ;;  %v678_v7 = vadd.f32 %v677_v4, %v572_v1  ;;  %v576_v8 = vpop.f32.mrf.mxu0 }
  0xfb   : > { %v681_v10 = vpop.f32.mrf.mxu1 }
  0xfc   : > { %920 = vst.msk [vmem:[%s1401_s17 + $0x48] sm:$0xff] %vm911_vm1, %v903_v6  ;;  %v904_v0 = vmul.f32 %v888_v5, %v748_v31  ;;  %v749_v12 = vadd.f32 %v1372_v22, %v678_v7  ;;  %v682_v13 = vadd.f32 %v681_v10, %v576_v8  ;;  %v578_v14 = vpop.f32.mrf.mxu0 }
  0xfd   : > { %v683_v16 = vpop.f32.mrf.mxu1 }
  0xfe   : > { %921 = vst [vmem:[%s1401_s17 + $0x50] sm:$0xff] %v904_v0  ;;  %v905_v24 = vmul.f32 %v889_v11, %v749_v12  ;;  %v750_v35 = vadd.f32 %v1374_v23, %v682_v13  ;;  %v684_v25 = vadd.f32 %v683_v16, %v578_v14  ;;  %v580_v26 = vpop.f32.mrf.mxu0 }
  0xff   : > { %v685_v22 = vpop.f32.mrf.mxu1 }
 0x100   : > { %922 = vst.msk [vmem:[%s1401_s17 + $0x58] sm:$0xff] %vm911_vm1, %v905_v24  ;;  %v906_v36 = vmul.f32 %v890_v17, %v750_v35  ;;  %v751_v32 = vadd.f32 %v1374_v23, %v684_v25  ;;  %v686_v33 = vadd.f32 %v685_v22, %v580_v26  ;;  %v582_v34 = vpop.f32.mrf.mxu0 }
 0x101   : > { %v687_v39 = vpop.f32.mrf.mxu1 }
 0x102   : > { %923 = vst [vmem:[%s1401_s17 + $0x60] sm:$0xff] %v906_v36  ;;  %v907_v42 = vmul.f32 %v891_v29, %v751_v32  ;;  %v752_v43 = vadd.f32 %v1393_v41, %v686_v33  ;;  %v688_v37 = vadd.f32 %v687_v39, %v582_v34 }
 0x104   : > { %924 = vst.msk [vmem:[%s1401_s17 + $0x68] sm:$0xff] %vm911_vm1, %v907_v42  ;;  %v908_v28 = vmul.f32 %v892_v40, %v752_v43  ;;  %v753_v44 = vadd.f32 %v1393_v41, %v688_v37 }
 0x106   : > { %925 = vst [vmem:[%s1401_s17 + $0x70] sm:$0xff] %v908_v28  ;;  %v909_v45 = vmul.f32 %v893_v38, %v753_v44 }
 0x108   : > { %926 = vst.msk [vmem:[%s1401_s17 + $0x78] sm:$0xff] %vm911_vm1, %v909_v45 }
 0x109 PF: > { %s18_s29 = sadd.s32 1, %s1137_s29   ;;  %s1478_s27 = smov %s1133_s28 }
 0x10a   : > { %p15_p5 = scmp.ge.s32.totalorder %s18_s29, 4   ;;  %s1479_s28 = smov %s1481_s30 }
 0x10c   :  { %17 = sbr.rel (!%p15_p5) target bundleno = 2 (0x2), region = 88 }

// kernel: cross_feature_module.5
= control target key start
LH: loop header
LB: loop body
LE: loop exit
PB: predicated region body
PF: predicated region fallthrough
CT: control target
= control target key end

     0   :  { %s1495_s27 = smov 0   ;;  %s1497_s28 = smov 0   ;;  %s1901_s0 = inlined_call_operand.vmem [shape: f32[2,128,64], index: 0, kind: input, shape index: {}]   ;;  %s1902_s1 = inlined_call_operand.vmem [shape: f32[2,128,64], index: 1, kind: input, shape index: {}]   ;;  %s1903_s2 = inlined_call_operand.vmem [shape: f32[2,1,64], index: 2, kind: input, shape index: {}]   ;;  %s1904_s3 = inlined_call_operand.vmem [shape: bf16[128,128], index: 3, kind: input, shape index: {}]   ;;  %s1905_s4 = inlined_call_operand.vmem [shape: bf16[128,128], index: 4, kind: input, shape index: {}]   ;;  %s1906_s5 = inlined_call_operand.vmem [shape: f32[128,1], index: 5, kind: input, shape index: {}]   ;;  %s1907_s6 = inlined_call_operand.vmem [shape: f32[128,1], index: 6, kind: input, shape index: {}]   ;;  %s1908_s7 = inlined_call_operand.vmem [shape: f32[128,1], index: 7, kind: input, shape index: {}]   ;;  %s1909_s8 = inlined_call_operand.vmem [shape: f32[2,128,64], index: 8, kind: output, shape index: {}]  }
   0x1   :  { %s1499_s29 = smov 0  }
   0x2 LB: > { %s30_s30 = sadd.s32 1, %s1443_s28  ;;  %p1257_p0 = scmp.ge.s32.totalorder %s1447_s29, 1  ;;  %s1447_s29 = sphi %s1499_s29, %s18_s29   ;;  %s1443_s28 = sphi %s1497_s28, %s1911_s28   ;;  %s1439_s27 = sphi %s1495_s27, %s1910_s27  }
   0x3   : > { %p32_p1 = scmp.ge.s32.totalorder %s30_s30, 2  ;;  %p309_p2 = scmp.lt.s32.totalorder %s1447_s29, 3 }
   0x5   : > { %s1913_s30 = smov (%p32_p1, %s30_s30), 0  ;;  %p310_p3 = pnand %p1257_p0, %p309_p2 }
   0x6   : > { %p363_p4 = scmp.lt.s32.totalorder (!%p310_p3), %s1439_s27, 1 }
   0x7   : > { %313 = sbr.rel (%p310_p3) target bundleno = 281 (0x119), region = 52 }
   0xc   : > { %v766_v0 = vld [vmem:[%s1906_s5 + $0x10] sm:$0xff]  ;;  %v764_v1 = vld [vmem:[%s1906_s5] sm:$0xff]  ;;  %v1449_v2 = vmov 0   ;;  %s1915_s27 = smov (!%p363_p4, %s1439_s27), 1  ;;  %v767_v3 = vld [vmem:[%s1906_s5 + $0x18] sm:$0xff]  ;;  %vm1123_vm0 = vcmask 523264  }
   0xd   : > { %1408 = vset.pattern.permute.xlu1 %v1449_v2  ;;  %1407 = vset.pattern.permute.xlu0 %v1449_v2  ;;  %v765_v4 = vld [vmem:[%s1906_s5 + $0x8] sm:$0xff]  ;;  %s1528_s17 = sshll.u32 %s1915_s27, 7  ;;  %v768_v14 = vld [vmem:[%s1906_s5 + $0x20] sm:$0xff]  ;;  %v771_v23 = vld [vmem:[%s1906_s5 + $0x38] sm:$0xff]  ;;  %s384_s11 = scalar_lea.vmem %s1903_s2, %s1915_s27 }
   0xe   : > { %792 = vperm.xlu1 %1408, %v766_v0   ;;  %782 = vperm.xlu0 %1407, %v764_v1   ;;  %s1534_s20 = scalar_lea.vmem %s1902_s1, %s1528_s17  ;;  %v769_v5 = vld [vmem:[%s1906_s5 + $0x28] sm:$0xff]  ;;  %s1545_s25 = scalar_lea.vmem %s1901_s0, %s1528_s17  ;;  %v770_v24 = vld [vmem:[%s1906_s5 + $0x30] sm:$0xff]  ;;  %v772_v32 = vld [vmem:[%s1906_s5 + $0x40] sm:$0xff] }
   0xf   : > { %v432_v6 = vld [vmem:[%s1534_s20 + $0x70] sm:$0xff]  ;;  %v433_v7 = vld [vmem:[%s1534_s20 + $0x78] sm:$0xff]  ;;  %v430_v8 = vld [vmem:[%s1534_s20 + $0x60] sm:$0xff]  ;;  %s1816_s13 = scalar_lea.vmem %s1909_s8, %s1528_s17 }
  0x10   : > { %v441_v9 = vpack.c.bf16 %v433_v7, %v432_v6  ;;  %v408_v10 = vld [vmem:[%s1545_s25 + $0x70] sm:$0xff]  ;;  %v409_v11 = vld [vmem:[%s1545_s25 + $0x78] sm:$0xff]  ;;  %v431_v12 = vld [vmem:[%s1534_s20 + $0x68] sm:$0xff] }
  0x11   : > { %v417_v13 = vpack.c.bf16 %v409_v11, %v408_v10  ;;  %v440_v15 = vpack.c.bf16 %v431_v12, %v430_v8  ;;  %v406_v16 = vld [vmem:[%s1545_s25 + $0x60] sm:$0xff]  ;;  %v407_v17 = vld [vmem:[%s1545_s25 + $0x68] sm:$0xff]  ;;  %v428_v19 = vld [vmem:[%s1534_s20 + $0x50] sm:$0xff] }
  0x12   : > { %797 = vperm.xlu1 %1408, %v767_v3   ;;  %787 = vperm.xlu0 %1407, %v765_v4   ;;  %v416_v18 = vpack.c.bf16 %v407_v17, %v406_v16  ;;  %v429_v20 = vld [vmem:[%s1534_s20 + $0x58] sm:$0xff]  ;;  %v404_v21 = vld [vmem:[%s1545_s25 + $0x50] sm:$0xff]  ;;  %v426_v27 = vld [vmem:[%s1534_s20 + $0x40] sm:$0xff] }
  0x13   : > { %1318 = vmatprep.subr.bf16.mxu0 %v441_v9  ;;  %1350 = vmatprep.subr.bf16.mxu1 %v417_v13  ;;  %v405_v22 = vld [vmem:[%s1545_s25 + $0x58] sm:$0xff]  ;;  %v439_v25 = vpack.c.bf16 %v429_v20, %v428_v19  ;;  %v427_v28 = vld [vmem:[%s1534_s20 + $0x48] sm:$0xff]  ;;  %v402_v29 = vld [vmem:[%s1545_s25 + $0x40] sm:$0xff] }
  0x14   : > { %1319 = vmatpush3.bf16.msra.mxu0 %v441_v9  ;;  %1351 = vmatpush3.bf16.msra.mxu1 %v417_v13  ;;  %v415_v26 = vpack.c.bf16 %v405_v22, %v404_v21  ;;  %v403_v30 = vld [vmem:[%s1545_s25 + $0x48] sm:$0xff]  ;;  %v438_v33 = vpack.c.bf16 %v427_v28, %v426_v27  ;;  %v424_v34 = vld [vmem:[%s1534_s20 + $0x30] sm:$0xff]  ;;  %v425_v35 = vld [vmem:[%s1534_s20 + $0x38] sm:$0xff] }
  0x15   : > { %1320 = vmatprep.subr.bf16.mxu0 %v440_v15  ;;  %1352 = vmatprep.subr.bf16.mxu1 %v416_v18  ;;  %v773_v31 = vld [vmem:[%s1906_s5 + $0x48] sm:$0xff]  ;;  %v400_v36 = vld [vmem:[%s1545_s25 + $0x30] sm:$0xff]  ;;  %v414_v37 = vpack.c.bf16 %v403_v30, %v402_v29  ;;  %v775_v38 = vld [vmem:[%s1906_s5 + $0x58] sm:$0xff]  ;;  %v437_v43 = vpack.c.bf16 %v425_v35, %v424_v34 }
  0x16   : > { %807 = vperm.xlu1 %1408, %v769_v5   ;;  %802 = vperm.xlu0 %1407, %v768_v14   ;;  %v401_v39 = vld [vmem:[%s1545_s25 + $0x38] sm:$0xff]  ;;  %v1409_v40 = vld [vmem:[%s1905_s4] sm:$0xff]   ;;  %v774_v42 = vld [vmem:[%s1906_s5 + $0x50] sm:$0xff] }
  0x17   : > { %v1410_v41 = vld [vmem:[%s1904_s3] sm:$0xff]   ;;  %v413_v44 = vpack.c.bf16 %v401_v39, %v400_v36  ;;  %v777_v45 = vld [vmem:[%s1906_s5 + $0x68] sm:$0xff]  ;;  %1334 = vmatprep.mubr.bf16.mxu0 %v1409_v40  ;;  %v420_v52 = vld [vmem:[%s1534_s20 + $0x10] sm:$0xff] }
  0x18   : > { %1321 = vmatpush3.bf16.msra.mxu0 %v440_v15  ;;  %1353 = vmatpush3.bf16.msra.mxu1 %v416_v18  ;;  %v422_v46 = vld [vmem:[%s1534_s20 + $0x20] sm:$0xff]  ;;  %v423_v47 = vld [vmem:[%s1534_s20 + $0x28] sm:$0xff]  ;;  %v421_v54 = vld [vmem:[%s1534_s20 + $0x18] sm:$0xff] }
  0x19   : > { %1322 = vmatprep.subr.bf16.mxu0 %v439_v25  ;;  %1354 = vmatprep.subr.bf16.mxu1 %v415_v26  ;;  %v398_v48 = vld [vmem:[%s1545_s25 + $0x20] sm:$0xff]  ;;  %v399_v49 = vld [vmem:[%s1545_s25 + $0x28] sm:$0xff]  ;;  %v436_v51 = vpack.c.bf16 %v423_v47, %v422_v46  ;;  %v396_v55 = vld [vmem:[%s1545_s25 + $0x10] sm:$0xff]  ;;  %v435_v60 = vpack.c.bf16 %v421_v54, %v420_v52 }
  0x1a   : > { %817 = vperm.xlu1 %1408, %v771_v23   ;;  %812 = vperm.xlu0 %1407, %v770_v24   ;;  %v776_v50 = vld [vmem:[%s1906_s5 + $0x60] sm:$0xff]  ;;  %v412_v53 = vpack.c.bf16 %v399_v49, %v398_v48  ;;  %v397_v56 = vld [vmem:[%s1545_s25 + $0x18] sm:$0xff]  ;;  %v778_v58 = vld [vmem:[%s1906_s5 + $0x70] sm:$0xff] }
  0x1b   : > { %1366 = vmatprep.mubr.bf16.mxu1 %v1410_v41  ;;  %v779_v57 = vld [vmem:[%s1906_s5 + $0x78] sm:$0xff]  ;;  %v418_v59 = vld [vmem:[%s1534_s20] sm:$0xff]  ;;  %v419_v61 = vld [vmem:[%s1534_s20 + $0x8] sm:$0xff]  ;;  %v411_v62 = vpack.c.bf16 %v397_v56, %v396_v55 }
  0x1c   : > { %1323 = vmatpush3.bf16.msra.mxu0 %v439_v25  ;;  %1355 = vmatpush3.bf16.msra.mxu1 %v415_v26  ;;  %v394_v63 = vld [vmem:[%s1545_s25] sm:$0xff]  ;;  %v395_v0 = vld [vmem:[%s1545_s25 + $0x8] sm:$0xff]  ;;  %v434_v3 = vpack.c.bf16 %v419_v61, %v418_v59  ;;  %v879_v5 = vld [vmem:[%s1907_s6 + $0x18] sm:$0xff] }
  0x1d   : > { %1324 = vmatprep.subr.bf16.mxu0 %v438_v33  ;;  %1356 = vmatprep.subr.bf16.mxu1 %v414_v37  ;;  %v877_v1 = vld [vmem:[%s1907_s6 + $0x8] sm:$0xff]  ;;  %v876_v2 = vld [vmem:[%s1907_s6] sm:$0xff]  ;;  %v410_v4 = vpack.c.bf16 %v395_v0, %v394_v63  ;;  %v878_v6 = vld [vmem:[%s1907_s6 + $0x10] sm:$0xff] }
  0x1e   : > { %827 = vperm.xlu1 %1408, %v773_v31   ;;  %822 = vperm.xlu0 %1407, %v772_v32   ;;  %v1411_v7 = vld [vmem:[%s1905_s4 + $0x8] sm:$0xff]   ;;  %v880_v10 = vld [vmem:[%s1907_s6 + $0x20] sm:$0xff]  ;;  %v1413_v11 = vld [vmem:[%s1905_s4 + $0x10] sm:$0xff]  }
  0x1f   : > { %v1412_v8 = vld [vmem:[%s1904_s3 + $0x8] sm:$0xff]   ;;  %v1414_v12 = vld [vmem:[%s1904_s3 + $0x10] sm:$0xff]   ;;  %v883_v13 = vld [vmem:[%s1907_s6 + $0x38] sm:$0xff] }
  0x20   : > { %1325 = vmatpush3.bf16.msra.mxu0 %v438_v33  ;;  %1357 = vmatpush3.bf16.msra.mxu1 %v414_v37  ;;  %v881_v9 = vld [vmem:[%s1907_s6 + $0x28] sm:$0xff]  ;;  %v882_v14 = vld [vmem:[%s1907_s6 + $0x30] sm:$0xff]  ;;  %v1415_v15 = vld [vmem:[%s1905_s4 + $0x18] sm:$0xff]  }
  0x21   : > { %1326 = vmatprep.subr.bf16.mxu0 %v437_v43  ;;  %1358 = vmatprep.subr.bf16.mxu1 %v413_v44  ;;  %v1416_v16 = vld [vmem:[%s1904_s3 + $0x18] sm:$0xff]   ;;  %v885_v17 = vld [vmem:[%s1907_s6 + $0x48] sm:$0xff]  ;;  %v884_v18 = vld [vmem:[%s1907_s6 + $0x40] sm:$0xff] }
  0x22   : > { %837 = vperm.xlu1 %1408, %v775_v38   ;;  %832 = vperm.xlu0 %1407, %v774_v42   ;;  %v1417_v19 = vld [vmem:[%s1905_s4 + $0x20] sm:$0xff]   ;;  %v887_v21 = vld [vmem:[%s1907_s6 + $0x58] sm:$0xff]  ;;  %v886_v22 = vld [vmem:[%s1907_s6 + $0x50] sm:$0xff] }
  0x23   : > { %v1418_v20 = vld [vmem:[%s1904_s3 + $0x20] sm:$0xff]   ;;  %v1419_v23 = vld [vmem:[%s1905_s4 + $0x28] sm:$0xff]   ;;  %v1421_v27 = vld [vmem:[%s1905_s4 + $0x30] sm:$0xff]  }
  0x24   : > { %1327 = vmatpush3.bf16.msra.mxu0 %v437_v43  ;;  %1359 = vmatpush3.bf16.msra.mxu1 %v413_v44  ;;  %v1420_v24 = vld [vmem:[%s1904_s3 + $0x28] sm:$0xff]   ;;  %v888_v26 = vld [vmem:[%s1907_s6 + $0x60] sm:$0xff]  ;;  %v1422_v28 = vld [vmem:[%s1904_s3 + $0x30] sm:$0xff]  }
  0x25   : > { %1328 = vmatprep.subr.bf16.mxu0 %v436_v51  ;;  %1360 = vmatprep.subr.bf16.mxu1 %v412_v53  ;;  %v889_v25 = vld [vmem:[%s1907_s6 + $0x68] sm:$0xff]  ;;  %v891_v29 = vld [vmem:[%s1907_s6 + $0x78] sm:$0xff]  ;;  %v890_v30 = vld [vmem:[%s1907_s6 + $0x70] sm:$0xff] }
  0x26   : > { %847 = vperm.xlu1 %1408, %v777_v45   ;;  %842 = vperm.xlu0 %1407, %v776_v50   ;;  %v1423_v31 = vld [vmem:[%s1905_s4 + $0x38] sm:$0xff]   ;;  %v996_v33 = vld [vmem:[%s1908_s7 + $0x8] sm:$0xff]  ;;  %v995_v34 = vld [vmem:[%s1908_s7] sm:$0xff] }
  0x27   : > { %v1424_v32 = vld [vmem:[%s1904_s3 + $0x38] sm:$0xff]   ;;  %v997_v36 = vld [vmem:[%s1908_s7 + $0x10] sm:$0xff]  ;;  %v1000_v37 = vld [vmem:[%s1908_s7 + $0x28] sm:$0xff] }
  0x28   : > { %1329 = vmatpush3.bf16.msra.mxu0 %v436_v51  ;;  %1361 = vmatpush3.bf16.msra.mxu1 %v412_v53  ;;  %v998_v35 = vld [vmem:[%s1908_s7 + $0x18] sm:$0xff]  ;;  %v999_v38 = vld [vmem:[%s1908_s7 + $0x20] sm:$0xff]  ;;  %v1001_v40 = vld [vmem:[%s1908_s7 + $0x30] sm:$0xff] }
  0x29   : > { %1330 = vmatprep.subr.bf16.mxu0 %v435_v60  ;;  %1362 = vmatprep.subr.bf16.mxu1 %v411_v62  ;;  %v1002_v39 = vld [vmem:[%s1908_s7 + $0x38] sm:$0xff]  ;;  %v1004_v41 = vld [vmem:[%s1908_s7 + $0x48] sm:$0xff]  ;;  %v1003_v42 = vld [vmem:[%s1908_s7 + $0x40] sm:$0xff] }
  0x2a   : > { %857 = vperm.xlu1 %1408, %v779_v57   ;;  %852 = vperm.xlu0 %1407, %v778_v58   ;;  %v1006_v43 = vld [vmem:[%s1908_s7 + $0x58] sm:$0xff]  ;;  %v1005_v44 = vld [vmem:[%s1908_s7 + $0x50] sm:$0xff]  ;;  %v1008_v45 = vld [vmem:[%s1908_s7 + $0x68] sm:$0xff] }
  0x2b   : > { %v1007_v46 = vld [vmem:[%s1908_s7 + $0x60] sm:$0xff]  ;;  %v1010_v47 = vld [vmem:[%s1908_s7 + $0x78] sm:$0xff]  ;;  %v1009_v48 = vld [vmem:[%s1908_s7 + $0x70] sm:$0xff] }
  0x2c   : > { %1331 = vmatpush3.bf16.msra.mxu0 %v435_v60  ;;  %1363 = vmatpush3.bf16.msra.mxu1 %v411_v62 }
  0x2d   : > { %1332 = vmatprep.subr.bf16.mxu0 %v434_v3  ;;  %1364 = vmatprep.subr.bf16.mxu1 %v410_v4 }
  0x2e   : > { %900 = vperm.xlu1 %1408, %v877_v1   ;;  %895 = vperm.xlu0 %1407, %v876_v2  }
  0x30   : > { %1333 = vmatpush3.bf16.msra.mxu0 %v434_v3  ;;  %1365 = vmatpush3.bf16.msra.mxu1 %v410_v4 }
  0x32   : > { %910 = vperm.xlu1 %1408, %v879_v5   ;;  %905 = vperm.xlu0 %1407, %v878_v6  }
  0x33   : > { %1335 = vmatmul.mubr.bf16.vlgmr.msra.gmra.mxu0 %v1411_v7  ;;  %1367 = vmatmul.mubr.bf16.vlgmr.msra.gmra.mxu1 %v1412_v8 }
  0x34   : > { %1338 = vmatprep.mubr.bf16.mxu0 %v1413_v11  ;;  %1370 = vmatprep.mubr.bf16.mxu1 %v1414_v12 }
  0x36   : > { %920 = vperm.xlu1 %1408, %v881_v9   ;;  %915 = vperm.xlu0 %1407, %v880_v10  }
  0x3a   : > { %930 = vperm.xlu1 %1408, %v883_v13   ;;  %925 = vperm.xlu0 %1407, %v882_v14  }
  0x3b   : > { %1339 = vmatmul.mubr.bf16.gmra.mxu0 %v1415_v15  ;;  %1371 = vmatmul.mubr.bf16.gmra.mxu1 %v1416_v16 }
  0x3c   : > { %1342 = vmatprep.mubr.bf16.mxu0 %v1417_v19  ;;  %1374 = vmatprep.mubr.bf16.mxu1 %v1418_v20 }
  0x3e   : > { %940 = vperm.xlu1 %1408, %v885_v17   ;;  %935 = vperm.xlu0 %1407, %v884_v18  }
  0x42   : > { %950 = vperm.xlu1 %1408, %v887_v21   ;;  %945 = vperm.xlu0 %1407, %v886_v22   ;;  %v1806_v22 = vld [vmem:[%s384_s11] ss:$0 sm:$0xff] }
  0x43   : > { %1343 = vmatmul.mubr.bf16.gmra.mxu0 %v1419_v23  ;;  %1375 = vmatmul.mubr.bf16.gmra.mxu1 %v1420_v24 }
  0x44   : > { %1346 = vmatprep.mubr.bf16.mxu0 %v1421_v27  ;;  %1378 = vmatprep.mubr.bf16.mxu1 %v1422_v28 }
  0x46   : > { %960 = vperm.xlu1 %1408, %v889_v25   ;;  %955 = vperm.xlu0 %1407, %v888_v26  }
  0x4a   : > { %970 = vperm.xlu1 %1408, %v891_v29   ;;  %965 = vperm.xlu0 %1407, %v890_v30  }
  0x4b   : > { %1347 = vmatmul.mubr.bf16.gmra.mxu0 %v1423_v31  ;;  %1379 = vmatmul.mubr.bf16.gmra.mxu1 %v1424_v32 }
  0x4e   : > { %1018 = vperm.xlu1 %1408, %v996_v33   ;;  %1013 = vperm.xlu0 %1407, %v995_v34  }
  0x52   : > { %1028 = vperm.xlu1 %1408, %v998_v35   ;;  %1023 = vperm.xlu0 %1407, %v997_v36  }
  0x56   : > { %1038 = vperm.xlu1 %1408, %v1000_v37   ;;  %1033 = vperm.xlu0 %1407, %v999_v38  }
  0x5a   : > { %1048 = vperm.xlu1 %1408, %v1002_v39   ;;  %1043 = vperm.xlu0 %1407, %v1001_v40  }
  0x5e   : > { %1058 = vperm.xlu1 %1408, %v1004_v41   ;;  %1053 = vperm.xlu0 %1407, %v1003_v42  }
  0x62   : > { %1068 = vperm.xlu1 %1408, %v1006_v43   ;;  %1063 = vperm.xlu0 %1407, %v1005_v44  }
  0x66   : > { %1078 = vperm.xlu1 %1408, %v1008_v45   ;;  %1073 = vperm.xlu0 %1407, %v1007_v46  }
  0x6a   : > { %1088 = vperm.xlu1 %1408, %v1010_v47   ;;  %1083 = vperm.xlu0 %1407, %v1009_v48  }
  0x89   : > { %v793_v49 = vpop.permute.xlu1 %792  ;;  %v783_v50 = vpop.permute.xlu0 %782 }
  0x8d   : > { %v1754_v51 = vpop.permute.xlu0 %787  ;;  %v1756_v52 = vpop.permute.xlu1 %797 }
  0x91   : > { %v1758_v53 = vpop.permute.xlu0 %802  ;;  %v1760_v54 = vpop.permute.xlu1 %807 }
  0x95   : > { %v1762_v55 = vpop.permute.xlu0 %812  ;;  %v1764_v56 = vpop.permute.xlu1 %817 }
  0x99   : > { %v1766_v57 = vpop.permute.xlu0 %822  ;;  %v1768_v58 = vpop.permute.xlu1 %827 }
  0x9d   : > { %v1770_v59 = vpop.permute.xlu0 %832  ;;  %v1772_v60 = vpop.permute.xlu1 %837 }
  0xa1   : > { %v1774_v61 = vpop.permute.xlu0 %842  ;;  %v1776_v62 = vpop.permute.xlu1 %847 }
  0xa5   : > { %v1778_v63 = vpop.permute.xlu0 %852  ;;  %v1780_v0 = vpop.permute.xlu1 %857 }
  0xa9   : > { %v896_v1 = vpop.permute.xlu0 %895  ;;  %v901_v2 = vpop.permute.xlu1 %900 }
  0xaa   : > { %v979_v31 = vmul.f32 %v1806_v22, %v896_v1  ;;  %v980_v44 = vmul.f32 %v1806_v22, %v901_v2 }
  0xad   : > { %v906_v3 = vpop.permute.xlu0 %905  ;;  %v911_v4 = vpop.permute.xlu1 %910 }
  0xae   : > { %v981_v27 = vmul.f32 %v1806_v22, %v906_v3  ;;  %v982_v36 = vmul.f32 %v1806_v22, %v911_v4 }
  0xb1   : > { %v916_v5 = vpop.permute.xlu0 %915  ;;  %v1782_v6 = vpop.permute.xlu1 %920 }
  0xb5   : > { %v926_v7 = vpop.permute.xlu0 %925  ;;  %v1784_v8 = vpop.permute.xlu1 %930 }
  0xb6   : > { %v985_v4 = vmul.f32 %v1806_v22, %v926_v7 }
  0xb9   : > { %v1786_v9 = vpop.permute.xlu0 %935  ;;  %v1788_v10 = vpop.permute.xlu1 %940 }
  0xbd   : > { %v1790_v11 = vpop.permute.xlu0 %945  ;;  %v1792_v12 = vpop.permute.xlu1 %950 }
  0xc1   : > { %v1794_v13 = vpop.permute.xlu0 %955  ;;  %v1796_v14 = vpop.permute.xlu1 %960 }
  0xc5   : > { %v1798_v15 = vpop.permute.xlu0 %965  ;;  %v1800_v16 = vpop.permute.xlu1 %970 }
  0xc9   : > { %v1014_v17 = vpop.permute.xlu0 %1013  ;;  %v1019_v18 = vpop.permute.xlu1 %1018 }
  0xca   : > { %v1091_v39 = vadd.f32 %v1014_v17, %v979_v31 }
  0xcd   : > { %v1024_v19 = vpop.permute.xlu0 %1023  ;;  %v1029_v20 = vpop.permute.xlu1 %1028 }
  0xce   : > { %v1093_v32 = vadd.f32 %v1024_v19, %v981_v27  ;;  %v1094_v47 = vadd.f32 %v1029_v20, %v982_v36  ;;  %v1092_v19 = vadd.f32 %v1019_v18, %v980_v44  ;;  %v984_v36 = vmul.f32 %v1806_v22, %v1782_v6 }
  0xd1   : > { %v1034_v21 = vpop.permute.xlu0 %1033  ;;  %v1808_v23 = vpop.permute.xlu1 %1038 }
  0xd5   : > { %v1044_v25 = vpop.permute.xlu0 %1043  ;;  %v1049_v37 = vpop.permute.xlu1 %1048 }
  0xd9   : > { %v1054_v45 = vpop.permute.xlu0 %1053  ;;  %v1828_v27 = vpop.permute.xlu1 %1058 }
  0xdd   : > { %v1064_v31 = vpop.permute.xlu0 %1063 }
  0xf3   : > { %v1336_v24 = vpop.f32.mrf.mxu0  ;;  %v1368_v26 = vpop.f32.mrf.mxu1 }
  0xf4   : > { %v710_v28 = vadd.f32 %v1368_v26, %v1336_v24  ;;  %v983_v26 = vmul.f32 %v1806_v22, %v916_v5 }
  0xf5   : > { %v556_v29 = vpop.f32.mrf.mxu0  ;;  %v701_v30 = vpop.f32.mrf.mxu1 }
  0xf6   : > { %v862_v33 = vadd.f32 %v793_v49, %v710_v28  ;;  %v702_v34 = vadd.f32 %v701_v30, %v556_v29 }
  0xf7   : > { %v1337_v35 = vpop.f32.mrf.mxu0  ;;  %v1369_v38 = vpop.f32.mrf.mxu1 }
  0xf8   : > { %v1109_v40 = vmul.f32 %v1093_v32, %v862_v33  ;;  %v860_v41 = vadd.f32 %v783_v50, %v702_v34  ;;  %v713_v42 = vadd.f32 %v1369_v38, %v1337_v35  ;;  %v1095_v33 = vadd.f32 %v1034_v21, %v983_v26 }
  0xf9   : > { %v559_v43 = vpop.f32.mrf.mxu0  ;;  %v704_v46 = vpop.f32.mrf.mxu1 }
  0xfa   : > { %1126 = vst.msk [vmem:[%s1816_s13 + $0x10] sm:$0xff] %vm1123_vm0, %v1109_v40  ;;  %v1107_v48 = vmul.f32 %v1091_v39, %v860_v41  ;;  %v863_v49 = vadd.f32 %v1756_v52, %v713_v42  ;;  %v705_v1 = vadd.f32 %v704_v46, %v559_v43  ;;  %v1097_v52 = vadd.f32 %v1044_v25, %v985_v4  ;;  %v1069_v42 = vpop.permute.xlu1 %1068 }
  0xfb   : > { %v1340_v3 = vpop.f32.mrf.mxu0  ;;  %v1372_v17 = vpop.f32.mrf.mxu1  ;;  %v989_v41 = vmul.f32 %v1806_v22, %v1790_v11  ;;  %v1096_v43 = vadd.f32 %v1808_v23, %v984_v36  ;;  %v990_v4 = vmul.f32 %v1806_v22, %v1792_v12 }
  0xfc   : > { %1124 = vst.msk [vmem:[%s1816_s13] sm:$0xff] %vm1123_vm0, %v1107_v48  ;;  %v1110_v50 = vmul.f32 %v1094_v47, %v863_v49  ;;  %v861_v2 = vadd.f32 %v1754_v51, %v705_v1  ;;  %v726_v24 = vadd.f32 %v1372_v17, %v1340_v3  ;;  %v986_v51 = vmul.f32 %v1806_v22, %v1784_v8  ;;  %v1074_v47 = vpop.permute.xlu0 %1073 }
  0xfd   : > { %v572_v20 = vpop.f32.mrf.mxu0  ;;  %v717_v28 = vpop.f32.mrf.mxu1  ;;  %v1101_v49 = vadd.f32 %v1064_v31, %v989_v41  ;;  %v1102_v26 = vadd.f32 %v1069_v42, %v990_v4 }
  0xfe   : > { %1127 = vst.msk [vmem:[%s1816_s13 + $0x18] sm:$0xff] %vm1123_vm0, %v1110_v50  ;;  %v1108_v29 = vmul.f32 %v1092_v19, %v861_v2  ;;  %v866_v7 = vadd.f32 %v1762_v55, %v726_v24  ;;  %v718_v18 = vadd.f32 %v717_v28, %v572_v20  ;;  %v1098_v38 = vadd.f32 %v1049_v37, %v986_v51  ;;  %v1079_v20 = vpop.permute.xlu1 %1078 }
  0xff   : > { %v1341_v30 = vpop.f32.mrf.mxu0  ;;  %v1373_v32 = vpop.f32.mrf.mxu1  ;;  %v988_v24 = vmul.f32 %v1806_v22, %v1788_v10 }
 0x100   : > { %1125 = vst.msk [vmem:[%s1816_s13 + $0x8] sm:$0xff] %vm1123_vm0, %v1108_v29  ;;  %v1113_v5 = vmul.f32 %v1097_v52, %v866_v7  ;;  %v864_v25 = vadd.f32 %v1758_v53, %v718_v18  ;;  %v729_v34 = vadd.f32 %v1373_v32, %v1341_v30  ;;  %v1084_v29 = vpop.permute.xlu0 %1083 }
 0x101   : > { %v575_v35 = vpop.f32.mrf.mxu0  ;;  %v720_v55 = vpop.f32.mrf.mxu1  ;;  %v1100_v18 = vadd.f32 %v1828_v27, %v988_v24 }
 0x102   : > { %1130 = vst.msk [vmem:[%s1816_s13 + $0x30] sm:$0xff] %vm1123_vm0, %v1113_v5  ;;  %v1111_v39 = vmul.f32 %v1095_v33, %v864_v25  ;;  %v867_v8 = vadd.f32 %v1764_v56, %v729_v34  ;;  %v721_v21 = vadd.f32 %v720_v55, %v575_v35  ;;  %v987_v56 = vmul.f32 %v1806_v22, %v1786_v9  ;;  %v1089_v35 = vpop.permute.xlu1 %1088 }
 0x103   : > { %v1344_v40 = vpop.f32.mrf.mxu0  ;;  %v1376_v53 = vpop.f32.mrf.mxu1  ;;  %v994_v34 = vmul.f32 %v1806_v22, %v1800_v16 }
 0x104   : > { %1128 = vst.msk [vmem:[%s1816_s13 + $0x20] sm:$0xff] %vm1123_vm0, %v1111_v39  ;;  %v1114_v6 = vmul.f32 %v1098_v38, %v867_v8  ;;  %v865_v37 = vadd.f32 %v1760_v54, %v721_v21  ;;  %v742_v44 = vadd.f32 %v1376_v53, %v1344_v40  ;;  %v1099_v17 = vadd.f32 %v1054_v45, %v987_v56 }
 0x105   : > { %v588_v46 = vpop.f32.mrf.mxu0  ;;  %v733_v48 = vpop.f32.mrf.mxu1  ;;  %v1106_v21 = vadd.f32 %v1089_v35, %v994_v34 }
 0x106   : > { %1131 = vst.msk [vmem:[%s1816_s13 + $0x38] sm:$0xff] %vm1123_vm0, %v1114_v6  ;;  %v1112_v11 = vmul.f32 %v1096_v43, %v865_v37  ;;  %v870_v23 = vadd.f32 %v1770_v59, %v742_v44  ;;  %v734_v1 = vadd.f32 %v733_v48, %v588_v46 }
 0x107   : > { %v1345_v3 = vpop.f32.mrf.mxu0  ;;  %v1377_v54 = vpop.f32.mrf.mxu1 }
 0x108   : > { %1129 = vst.msk [vmem:[%s1816_s13 + $0x28] sm:$0xff] %vm1123_vm0, %v1112_v11  ;;  %v1117_v19 = vmul.f32 %v1101_v49, %v870_v23  ;;  %v868_v9 = vadd.f32 %v1766_v57, %v734_v1  ;;  %v745_v50 = vadd.f32 %v1377_v54, %v1345_v3  ;;  %v993_v57 = vmul.f32 %v1806_v22, %v1798_v15 }
 0x109   : > { %v591_v2 = vpop.f32.mrf.mxu0  ;;  %v736_v59 = vpop.f32.mrf.mxu1 }
 0x10a   : > { %1134 = vst.msk [vmem:[%s1816_s13 + $0x50] sm:$0xff] %vm1123_vm0, %v1117_v19  ;;  %v1115_v28 = vmul.f32 %v1099_v17, %v868_v9  ;;  %v871_v12 = vadd.f32 %v1772_v60, %v745_v50  ;;  %v737_v45 = vadd.f32 %v736_v59, %v591_v2  ;;  %v991_v60 = vmul.f32 %v1806_v22, %v1794_v13 }
 0x10b   : > { %v1348_v52 = vpop.f32.mrf.mxu0  ;;  %v1380_v7 = vpop.f32.mrf.mxu1  ;;  %v1105_v33 = vadd.f32 %v1084_v29, %v993_v57 }
 0x10c   : > { %1132 = vst.msk [vmem:[%s1816_s13 + $0x40] sm:$0xff] %vm1123_vm0, %v1115_v28  ;;  %v1118_v10 = vmul.f32 %v1102_v26, %v871_v12  ;;  %v869_v30 = vadd.f32 %v1768_v58, %v737_v45  ;;  %v758_v51 = vadd.f32 %v1380_v7, %v1348_v52  ;;  %v1103_v36 = vadd.f32 %v1074_v47, %v991_v60 }
 0x10d   : > { %v604_v31 = vpop.f32.mrf.mxu0  ;;  %v749_v32 = vpop.f32.mrf.mxu1 }
 0x10e   : > { %1135 = vst.msk [vmem:[%s1816_s13 + $0x58] sm:$0xff] %vm1123_vm0, %v1118_v10  ;;  %v1116_v15 = vmul.f32 %v1100_v18, %v869_v30  ;;  %v874_v5 = vadd.f32 %v1778_v63, %v758_v51  ;;  %v750_v27 = vadd.f32 %v749_v32, %v604_v31  ;;  %v992_v63 = vmul.f32 %v1806_v22, %v1796_v14 }
 0x10f   : > { %v1349_v25 = vpop.f32.mrf.mxu0  ;;  %v1381_v58 = vpop.f32.mrf.mxu1 }
 0x110   : > { %1133 = vst.msk [vmem:[%s1816_s13 + $0x48] sm:$0xff] %vm1123_vm0, %v1116_v15  ;;  %v1121_v13 = vmul.f32 %v1105_v33, %v874_v5  ;;  %v872_v55 = vadd.f32 %v1774_v61, %v750_v27  ;;  %v761_v38 = vadd.f32 %v1381_v58, %v1349_v25  ;;  %v1104_v42 = vadd.f32 %v1079_v20, %v992_v63 }
 0x111   : > { %v607_v39 = vpop.f32.mrf.mxu0  ;;  %v752_v8 = vpop.f32.mrf.mxu1 }
 0x112   : > { %1138 = vst.msk [vmem:[%s1816_s13 + $0x70] sm:$0xff] %vm1123_vm0, %v1121_v13  ;;  %v1119_v16 = vmul.f32 %v1103_v36, %v872_v55  ;;  %v875_v40 = vadd.f32 %v1780_v0, %v761_v38  ;;  %v753_v41 = vadd.f32 %v752_v8, %v607_v39 }
 0x114   : > { %1136 = vst.msk [vmem:[%s1816_s13 + $0x60] sm:$0xff] %vm1123_vm0, %v1119_v16  ;;  %v1122_v53 = vmul.f32 %v1106_v21, %v875_v40  ;;  %v873_v61 = vadd.f32 %v1776_v62, %v753_v41 }
 0x116   : > { %1139 = vst.msk [vmem:[%s1816_s13 + $0x78] sm:$0xff] %vm1123_vm0, %v1122_v53  ;;  %v1120_v43 = vmul.f32 %v1104_v42, %v873_v61 }
 0x118   : > { %1137 = vst.msk [vmem:[%s1816_s13 + $0x68] sm:$0xff] %vm1123_vm0, %v1120_v43 }
 0x119 PF: > { %s18_s29 = sadd.s32 1, %s1447_s29   ;;  %s1910_s27 = smov %s1443_s28 }
 0x11a   : > { %p15_p5 = scmp.ge.s32.totalorder %s18_s29, 4   ;;  %s1911_s28 = smov %s1913_s30 }
 0x11c   :  { %17 = sbr.rel (!%p15_p5) target bundleno = 2 (0x2), region = 88 }

// kernel: cross_feature_module.3
= control target key start
LH: loop header
LB: loop body
LE: loop exit
PB: predicated region body
PF: predicated region fallthrough
CT: control target
= control target key end

     0   :  { %s956_s27 = smov 0   ;;  %s958_s28 = smov 0   ;;  %s1070_s0 = inlined_call_operand.vmem [shape: f32[2,32,256], index: 0, kind: input, shape index: {}]   ;;  %s1071_s1 = inlined_call_operand.vmem [shape: f32[2,32,256], index: 1, kind: input, shape index: {}]   ;;  %s1072_s2 = inlined_call_operand.vmem [shape: f32[2,1,256], index: 2, kind: input, shape index: {}]   ;;  %s1073_s3 = inlined_call_operand.vmem [shape: bf16[32,32], index: 3, kind: input, shape index: {}]   ;;  %s1074_s4 = inlined_call_operand.vmem [shape: bf16[32,32], index: 4, kind: input, shape index: {}]   ;;  %s1075_s5 = inlined_call_operand.vmem [shape: f32[32,1], index: 5, kind: input, shape index: {}]   ;;  %s1076_s6 = inlined_call_operand.vmem [shape: f32[32,1], index: 6, kind: input, shape index: {}]   ;;  %s1077_s7 = inlined_call_operand.vmem [shape: f32[32,1], index: 7, kind: input, shape index: {}]   ;;  %s1078_s8 = inlined_call_operand.vmem [shape: f32[2,32,256], index: 8, kind: output, shape index: {}]  }
   0x1   :  { %s960_s29 = smov 0  }
   0x2 LB: > { %s30_s30 = sadd.s32 1, %s904_s28  ;;  %p834_p0 = scmp.ge.s32.totalorder %s908_s29, 1  ;;  %s908_s29 = sphi %s960_s29, %s18_s29   ;;  %s904_s28 = sphi %s958_s28, %s1080_s28   ;;  %s900_s27 = sphi %s956_s27, %s1079_s27  }
   0x3   : > { %p32_p1 = scmp.ge.s32.totalorder %s30_s30, 2  ;;  %p316_p2 = scmp.lt.s32.totalorder %s908_s29, 3 }
   0x5   : > { %s1082_s30 = smov (%p32_p1, %s30_s30), 0  ;;  %p317_p3 = pnand %p834_p0, %p316_p2 }
   0x6   : > { %p376_p4 = scmp.lt.s32.totalorder (!%p317_p3), %s900_s27, 1 }
   0x7   : > { %320 = sbr.rel (%p317_p3) target bundleno = 242 (0xf2), region = 52 }
   0xc   : > { %v910_v0 = vmov 0   ;;  %s1084_s27 = smov (!%p376_p4, %s900_s27), 1  ;;  %v620_v1 = vld [vmem:[%s1076_s6 + $0x10] sm:$0xff]  ;;  %v618_v2 = vld [vmem:[%s1076_s6] sm:$0xff]  ;;  %v621_v3 = vld [vmem:[%s1076_s6 + $0x18] sm:$0xff]  ;;  %vm457_vm0 = vcmask 261120   ;;  %v644_v43 = vlaneseq }
   0xd   : > { %496 = vmatprep.mubr.bf16.mxu0 %v910_v0  ;;  %565 = vmatprep.mubr.bf16.mxu1 %v910_v0  ;;  %s977_s9 = sshll.u32 %s1084_s27, 6  ;;  %v619_v7 = vld [vmem:[%s1076_s6 + $0x8] sm:$0xff]  ;;  %v586_v30 = vld [vmem:[%s1075_s5] sm:$0xff]  ;;  %v589_v33 = vld [vmem:[%s1075_s5 + $0x18] sm:$0xff]  ;;  %s839_s14 = sshll.u32 %s1084_s27, 1 }
   0xe   : > { %881 = vset.pattern.permute.xlu1 %v910_v0  ;;  %880 = vset.pattern.permute.xlu0 %v910_v0  ;;  %s393_s16 = scalar_lea.vmem %s1071_s1, %s977_s9  ;;  %s383_s21 = scalar_lea.vmem %s1070_s0, %s977_s9  ;;  %v587_v17 = vld [vmem:[%s1075_s5 + $0x8] sm:$0xff]  ;;  %v882_v31 = vld [vmem:[%s1074_s4] sm:$0xff]   ;;  %v588_v34 = vld [vmem:[%s1075_s5 + $0x10] sm:$0xff]  ;;  %v645_v45 = vshrl.u32 %v644_v43, 7 }
   0xf   : > { %635 = vperm.xlu1 %881, %v620_v1   ;;  %625 = vperm.xlu0 %880, %v618_v2   ;;  %v432_v4 = vld [vmem:[%s393_s16 + $0x28] sm:$0xff]  ;;  %v434_v5 = vld [vmem:[%s393_s16 + $0x38] sm:$0xff]  ;;  %v431_v6 = vld [vmem:[%s393_s16 + $0x20] sm:$0xff]  ;;  %s402_s17 = scalar_lea.vmem %s1072_s2, %s839_s14  ;;  %s1049_s19 = scalar_lea.vmem %s1078_s8, %s977_s9 }
  0x10   : > { %v438_v8 = vpack.c.bf16 %v434_v5, %v432_v4  ;;  %v420_v9 = vld [vmem:[%s383_s21 + $0x28] sm:$0xff]  ;;  %v422_v10 = vld [vmem:[%s383_s21 + $0x38] sm:$0xff]  ;;  %v433_v11 = vld [vmem:[%s393_s16 + $0x30] sm:$0xff]  ;;  %v646_v48 = vsub.s32 0, %v645_v45  ;;  %v650_v50 = vsub.s32 1, %v645_v45 }
  0x11   : > { %v426_v12 = vpack.c.bf16 %v422_v10, %v420_v9  ;;  %v437_v13 = vpack.c.bf16 %v433_v11, %v431_v6  ;;  %v419_v14 = vld [vmem:[%s383_s21 + $0x20] sm:$0xff]  ;;  %v421_v15 = vld [vmem:[%s383_s21 + $0x30] sm:$0xff]  ;;  %v428_v16 = vld [vmem:[%s393_s16 + $0x8] sm:$0xff] }
  0x12   : > { %476 = vmatprep.subr.bf16.mxu0 %v438_v8  ;;  %v425_v18 = vpack.c.bf16 %v421_v15, %v419_v14  ;;  %v430_v19 = vld [vmem:[%s393_s16 + $0x18] sm:$0xff]  ;;  %v416_v20 = vld [vmem:[%s383_s21 + $0x8] sm:$0xff]  ;;  %v427_v24 = vld [vmem:[%s393_s16] sm:$0xff] }
  0x13   : > { %v418_v21 = vld [vmem:[%s383_s21 + $0x18] sm:$0xff]  ;;  %640 = vperm.xlu1 %881, %v621_v3   ;;  %545 = vmatprep.subr.bf16.mxu1 %v426_v12  ;;  %v436_v22 = vpack.c.bf16 %v430_v19, %v428_v16  ;;  %v429_v25 = vld [vmem:[%s393_s16 + $0x10] sm:$0xff]  ;;  %v415_v26 = vld [vmem:[%s383_s21] sm:$0xff] }
  0x14   : > { %477 = vmatpush1.bf16.msra.mxu0 %v437_v13  ;;  %v424_v23 = vpack.c.bf16 %v418_v21, %v416_v20  ;;  %546 = vmatpush1.bf16.msra.mxu1 %v425_v18  ;;  %v435_v27 = vpack.c.bf16 %v429_v25, %v427_v24  ;;  %v417_v28 = vld [vmem:[%s383_s21 + $0x10] sm:$0xff]  ;;  %v883_v32 = vld [vmem:[%s1073_s3] sm:$0xff]   ;;  %v663_v35 = vld [vmem:[%s1077_s7 + $0x8] sm:$0xff] }
  0x15   : > { %630 = vperm.xlu0 %880, %v619_v7   ;;  %478 = vmatprep.subr.bf16.mxu0 %v436_v22  ;;  %v423_v29 = vpack.c.bf16 %v417_v28, %v415_v26  ;;  %v662_v36 = vld [vmem:[%s1077_s7] sm:$0xff]  ;;  %v884_v37 = vld [vmem:[%s1074_s4 + $0x8] sm:$0xff]   ;;  %v665_v39 = vld [vmem:[%s1077_s7 + $0x18] sm:$0xff] }
  0x16   : > { %547 = vmatprep.subr.bf16.mxu1 %v424_v23  ;;  %v885_v38 = vld [vmem:[%s1073_s3 + $0x8] sm:$0xff]   ;;  %v664_v40 = vld [vmem:[%s1077_s7 + $0x10] sm:$0xff]  ;;  %v622_v49 = vld [vmem:[%s402_s17] sm:$0x3] }
  0x17   : > { %597 = vperm.xlu1 %881, %v587_v17   ;;  %v647_v52 = vrot.slane %v622_v49, %v646_v48  ;;  %v651_v54 = vrot.slane %v622_v49, %v650_v50 }
  0x18   : > { %479 = vmatpush1.bf16.msra.mxu0 %v435_v27  ;;  %548 = vmatpush1.bf16.msra.mxu1 %v423_v29 }
  0x19   : > { %592 = vperm.xlu0 %880, %v586_v30  }
  0x1b   : > { %844 = vmatmul.mubr.msk.bf16.vlgmr.msra.gmra.mxu0 %vm457_vm0, %v882_v31  ;;  %607 = vperm.xlu1 %881, %v589_v33  }
  0x1c   : > { %848 = vmatmul.mubr.msk.bf16.vlgmr.msra.gmra.mxu1 %vm457_vm0, %v883_v32  ;;  %506 = vmatprep.mubr.bf16.mxu0 %v910_v0 }
  0x1d   : > { %575 = vmatprep.mubr.bf16.mxu1 %v910_v0  ;;  %602 = vperm.xlu0 %880, %v588_v34  }
  0x1f   : > { %673 = vperm.xlu1 %881, %v663_v35  }
  0x21   : > { %668 = vperm.xlu0 %880, %v662_v36  }
  0x23   : > { %845 = vmatmul.mubr.msk.bf16.gmra.mxu0 %vm457_vm0, %v884_v37  ;;  %683 = vperm.xlu1 %881, %v665_v39  }
  0x24   : > { %849 = vmatmul.mubr.msk.bf16.gmra.mxu1 %vm457_vm0, %v885_v38 }
  0x25   : > { %678 = vperm.xlu0 %880, %v664_v40  }
  0x8a   : > { %v626_v41 = vpop.permute.xlu0 %625  ;;  %v636_v42 = vpop.permute.xlu1 %635 }
  0x8b   : > { %v654_v55 = vmul.f32 %v647_v52, %v626_v41  ;;  %v655_v59 = vmul.f32 %v651_v54, %v626_v41  ;;  %v658_v12 = vmul.f32 %v647_v52, %v636_v42  ;;  %v659_v20 = vmul.f32 %v651_v54, %v636_v42 }
  0x8e   : > { %v641_v46 = vpop.permute.xlu1 %640 }
  0x8f   : > { %v660_v28 = vmul.f32 %v647_v52, %v641_v46  ;;  %v661_v35 = vmul.f32 %v651_v54, %v641_v46 }
  0x90   : > { %v631_v44 = vpop.permute.xlu0 %630 }
  0x91   : > { %v656_v0 = vmul.f32 %v647_v52, %v631_v44  ;;  %v657_v5 = vmul.f32 %v651_v54, %v631_v44 }
  0x92   : > { %v598_v51 = vpop.permute.xlu1 %597 }
  0x94   : > { %v593_v47 = vpop.permute.xlu0 %592 }
  0x96   : > { %v1043_v57 = vpop.permute.xlu1 %607 }
  0x98   : > { %v603_v53 = vpop.permute.xlu0 %602 }
  0x9a   : > { %v674_v13 = vpop.permute.xlu1 %673 }
  0x9b   : > { %v688_v15 = vadd.f32 %v674_v13, %v656_v0  ;;  %v689_v23 = vadd.f32 %v674_v13, %v657_v5 }
  0x9c   : > { %v669_v62 = vpop.permute.xlu0 %668 }
  0x9d   : > { %v686_v1 = vadd.f32 %v669_v62, %v654_v55  ;;  %v687_v7 = vadd.f32 %v669_v62, %v655_v59 }
  0x9e   : > { %v684_v36 = vpop.permute.xlu1 %683 }
  0x9f   : > { %v692_v44 = vadd.f32 %v684_v36, %v660_v28  ;;  %v693_v49 = vadd.f32 %v684_v36, %v661_v35 }
  0xa0   : > { %v679_v21 = vpop.permute.xlu0 %678 }
  0xa1   : > { %v690_v30 = vadd.f32 %v679_v21, %v658_v12  ;;  %v691_v38 = vadd.f32 %v679_v21, %v659_v20 }
  0xdb   : > { %v498_v56 = vpop.f32.mrf.mxu0 }
  0xdc   : > { %v567_v58 = vpop.f32.mrf.mxu1 }
  0xdd   : > { %v568_v60 = vadd.f32 %v567_v58, %v498_v56  ;;  %v500_v61 = vpop.f32.mrf.mxu0 }
  0xde   : > { %v569_v63 = vpop.f32.mrf.mxu1 }
  0xdf   : > { %v610_v2 = vadd.f32 %v593_v47, %v568_v60  ;;  %v570_v3 = vadd.f32 %v569_v63, %v500_v61  ;;  %v502_v4 = vpop.f32.mrf.mxu0 }
  0xe0   : > { %v571_v6 = vpop.f32.mrf.mxu1 }
  0xe1   : > { %v694_v8 = vmul.f32 %v686_v1, %v610_v2  ;;  %v611_v9 = vadd.f32 %v593_v47, %v570_v3  ;;  %v572_v10 = vadd.f32 %v571_v6, %v502_v4  ;;  %v504_v11 = vpop.f32.mrf.mxu0 }
  0xe2   : > { %v573_v14 = vpop.f32.mrf.mxu1 }
  0xe3   : > { %702 = vst [vmem:[%s1049_s19] sm:$0xff] %v694_v8  ;;  %v695_v16 = vmul.f32 %v687_v7, %v611_v9  ;;  %v612_v17 = vadd.f32 %v598_v51, %v572_v10  ;;  %v574_v18 = vadd.f32 %v573_v14, %v504_v11  ;;  %v508_v19 = vpop.f32.mrf.mxu0 }
  0xe4   : > { %v577_v22 = vpop.f32.mrf.mxu1 }
  0xe5   : > { %703 = vst [vmem:[%s1049_s19 + $0x8] sm:$0xff] %v695_v16  ;;  %v696_v24 = vmul.f32 %v688_v15, %v612_v17  ;;  %v613_v25 = vadd.f32 %v598_v51, %v574_v18  ;;  %v578_v26 = vadd.f32 %v577_v22, %v508_v19  ;;  %v510_v27 = vpop.f32.mrf.mxu0 }
  0xe6   : > { %v579_v29 = vpop.f32.mrf.mxu1 }
  0xe7   : > { %704 = vst [vmem:[%s1049_s19 + $0x10] sm:$0xff] %v696_v24  ;;  %v697_v31 = vmul.f32 %v689_v23, %v613_v25  ;;  %v614_v32 = vadd.f32 %v603_v53, %v578_v26  ;;  %v580_v33 = vadd.f32 %v579_v29, %v510_v27  ;;  %v512_v34 = vpop.f32.mrf.mxu0 }
  0xe8   : > { %v581_v37 = vpop.f32.mrf.mxu1 }
  0xe9   : > { %705 = vst [vmem:[%s1049_s19 + $0x18] sm:$0xff] %v697_v31  ;;  %v698_v39 = vmul.f32 %v690_v30, %v614_v32  ;;  %v615_v40 = vadd.f32 %v603_v53, %v580_v33  ;;  %v582_v41 = vadd.f32 %v581_v37, %v512_v34  ;;  %v514_v42 = vpop.f32.mrf.mxu0 }
  0xea   : > { %v583_v43 = vpop.f32.mrf.mxu1 }
  0xeb   : > { %706 = vst [vmem:[%s1049_s19 + $0x20] sm:$0xff] %v698_v39  ;;  %v699_v45 = vmul.f32 %v691_v38, %v615_v40  ;;  %v616_v47 = vadd.f32 %v1043_v57, %v582_v41  ;;  %v584_v48 = vadd.f32 %v583_v43, %v514_v42 }
  0xed   : > { %707 = vst [vmem:[%s1049_s19 + $0x28] sm:$0xff] %v699_v45  ;;  %v700_v46 = vmul.f32 %v692_v44, %v616_v47  ;;  %v617_v50 = vadd.f32 %v1043_v57, %v584_v48 }
  0xef   : > { %708 = vst [vmem:[%s1049_s19 + $0x30] sm:$0xff] %v700_v46  ;;  %v701_v51 = vmul.f32 %v693_v49, %v617_v50 }
  0xf1   : > { %709 = vst [vmem:[%s1049_s19 + $0x38] sm:$0xff] %v701_v51 }
  0xf2 PF: > { %s18_s29 = sadd.s32 1, %s908_s29   ;;  %s1079_s27 = smov %s904_s28 }
  0xf3   : > { %p15_p5 = scmp.ge.s32.totalorder %s18_s29, 4   ;;  %s1080_s28 = smov %s1082_s30 }
  0xf5   :  { %17 = sbr.rel (!%p15_p5) target bundleno = 2 (0x2), region = 88 }

</bundles_post_ra>
